<compile_context>
chip_gen: v5e
topology: v5e:2x2
jax: 0.10.0
libtpu: 0.0.40
codegen_flags: <defaults>
</compile_context>

<pallas_src>
import functools

import jax
import jax.numpy as jnp
from jax.experimental import pallas as pl
from jax.experimental.pallas import tpu as pltpu

LANE = 128      # TPU lane width: Cmid / Cout are padded to a multiple of this
SUBLANE = 8     # TPU sublane width


def _round_up(v, m):
    return (v + m - 1) // m * m


def _pad2(a, rows, cols):
    """Zero-pad a 2-D array up to (rows, cols)."""
    out = jnp.zeros((rows, cols), a.dtype)
    return out.at[:a.shape[0], :a.shape[1]].set(a)


def _vmem_capacity_bytes():
    """Per-core VMEM capacity; conservative (v7x-sized) fallback if unknown."""
    try:
        info = pltpu.get_tpu_info()
        cap = getattr(info, "vmem_capacity_bytes", None)
        if cap:
            return int(cap)
    except Exception:
        pass
    return 64 * 1024 * 1024


def _vmem_step_bytes(TH, Wo, Wp, Ci_p, Cm_p, Co_p, k, stride):
    """Rough per-grid-step working-set estimate (double-buffered I/O + live values)."""
    halo = k - stride
    th_blk = TH * stride
    th_in = th_blk + halo
    bpx_in = 2  # bf16 input activations
    pipe = (2 * th_blk * Wp * Ci_p * bpx_in            # double-buffered body strip
            + 2 * max(halo, 1) * Wp * Ci_p * bpx_in    # double-buffered halo rows
            + 2 * TH * Wo * Co_p * 4)                  # double-buffered f32 output
    weights = 2 * (Ci_p * Cm_p * 2 + Cm_p * Co_p * 2 + Ci_p * Co_p * 2
                   + (k * k + 2) * Cm_p * 4 + Co_p * 4)
    live = (th_in * Wp * Ci_p * bpx_in                 # concatenated input strip
            + 2 * th_in * Wp * Cm_p * 4                # mid (+ one temporary)
            + 2 * TH * Wo * Cm_p * 4                   # depthwise acc + mid2
            + 2 * TH * Wo * Co_p * 4)                  # out (+ temporary)
    return int((pipe + weights + live) * 1.25)         # fudge for compiler temps


def _pick_tile_h(Ho, Wo, Wp, Ci_p, Cm_p, Co_p, k, stride, target, vmem_budget):
    """Pick the output-row strip height TH:
       - TH divides Ho                              (strips tile the output)
       - TH*Wo multiple of 8 (or TH == Ho)          (aligned output stores)
       - TH*stride multiple of (k - stride)         (halo side-fetch is exactly
                                                      `halo` rows, no over-fetch)
       - >= 2 strips when possible                  (both v7x TensorCores busy)
       - per-step working set fits the VMEM budget."""
    halo = k - stride
    if Ho >= 2:
        target = min(target, max(1, Ho // 2))
    target = max(1, min(target, Ho))
    cands = []
    for th in range(target, 0, -1):
        if Ho % th:
            continue
        if th != Ho and (th * Wo) % SUBLANE:
            continue
        if halo > 0 and (th * stride) % halo:
            continue
        cands.append(th)
    if not cands:
        return Ho                                    # whole image in one strip
    for th in cands:                                 # biggest strip within budget
        if _vmem_step_bytes(th, Wo, Wp, Ci_p, Cm_p, Co_p, k, stride) <= vmem_budget:
            return th
    return cands[-1]                                 # smallest legal strip


# ---------------------------------------------------------------------------
# Fused kernel: expand 1x1 (+bias +ReLU6) -> depthwise kxk (+bias +ReLU6)
#               -> project 1x1 (+bias) -> (+ residual)
# BN scales are pre-folded into the weights in the wrapper.
# ---------------------------------------------------------------------------
def _inv_bottleneck_kernel(xa_ref, xb_ref, ibw_ref, ibb_ref,
                           dww_ref, dwb_ref, pww_ref, pwb_ref, rem_ref,
                           o_ref, *, k, stride, pad, H, W, TH, Wo, residual):
    th_blk = TH * stride                 # padded input rows owned by this strip
    halo = max(k - stride, 0)            # rows borrowed from the next strip
    th_in = th_blk + halo
    Wp = xa_ref.shape[1]
    Ci = xa_ref.shape[2]
    Cm = ibw_ref.shape[1]

    hi = pl.program_id(1)                # strip index along H

    # ---- assemble the input strip: body rows + the few halo rows (bf16, tiny)
    if halo > 0:
        xin = jnp.concatenate([xa_ref[...], xb_ref[0:halo]], axis=0)
    else:
        xin = xa_ref[...]                                    # (th_in, Wp, Ci) bf16

    # ---- 1) expand 1x1 conv (MXU bf16 / f32 accum, BN scale folded) + ReLU6
    x2d = xin.reshape(th_in * Wp, Ci)
    mid = jnp.dot(x2d, ibw_ref[...], preferred_element_type=jnp.float32)
    mid = jnp.clip(mid + ibb_ref[...], 0.0, 6.0)
    mid = mid.reshape(th_in, Wp, Cm)

    # Zero the depthwise conv's zero-padding region: pad rows/cols picked up the
    # clipped expansion bias and must be exactly 0.  Cheap (th_in, Wp, 1) mask.
    row_g = jax.lax.broadcasted_iota(jnp.int32, (th_in, Wp, 1), 0) + hi * th_blk
    col_g = jax.lax.broadcasted_iota(jnp.int32, (th_in, Wp, 1), 1)
    valid = ((row_g >= pad) & (row_g < H + pad) &
             (col_g >= pad) & (col_g < W + pad))             # (th_in, Wp, 1)
    mid = jnp.where(valid, mid, 0.0)

    # ---- 2) depthwise k x k conv (VPU MACs, f32; BN scale folded into taps)
    dww = dww_ref[...]                                       # (k*k, Cm) f32
    w_taps = [dww[t:t + 1].reshape(1, 1, Cm) for t in range(k * k)]   # hoisted
    w_stop = (Wo - 1) * stride + 1
    acc = jnp.zeros((TH, Wo, Cm), jnp.float32)
    for i in range(k):
        rows = mid[i:i + (TH - 1) * stride + 1:stride]       # (TH, Wp, Cm)
        for j in range(k):
            if stride == 1:
                tap = rows[:, j:j + Wo, :]
            else:
                # subsample W per tap: acc stays Wo wide (no wasted VALU work)
                tap = rows[:, j:j + w_stop:stride, :]
            acc = acc + tap * w_taps[i * k + j]
    mid2 = jnp.clip(acc.reshape(TH * Wo, Cm) + dwb_ref[...], 0.0, 6.0)

    # ---- 3) project 1x1 conv (MXU bf16 / f32 accum, BN scale folded) + bias
    out = jnp.dot(mid2.astype(jnp.bfloat16), pww_ref[...],
                  preferred_element_type=jnp.float32)
    out = out + pwb_ref[...]

    # ---- 4) residual (stride==1, Cin==Cout): route the bf16 input strip through
    #         a (Ci -> Co_p) identity-embedding matmul on the MXU, which both
    #         zero-extends the channel dim and converts exactly to f32.
    if residual:
        res = xin[pad:pad + TH, pad:pad + Wo, :].reshape(TH * Wo, Ci)
        out = out + jnp.dot(res, rem_ref[...], preferred_element_type=jnp.float32)

    o_ref[...] = out.astype(o_ref.dtype)


# ---------------------------------------------------------------------------
# Public wrapper: NCHW in -> NCHW out, matching the PyTorch module.
# ---------------------------------------------------------------------------
def inv_bottleneck(x_nchw, p, *, kernel_size, stride, residual, tile_h=32):
    N, Cin, H, W = x_nchw.shape
    k = kernel_size
    pad = (k - 1) // 2
    Ho = (H + 2 * pad - k) // stride + 1
    Wo = (W + 2 * pad - k) // stride + 1
    Cmid = p['ib_w'].shape[1]
    Cout = p['pw_w'].shape[1]
    if residual:
        assert stride == 1 and Cin == Cout, "residual needs stride=1 and Cin==Cout"

    # Channel padding: input only to a sublane multiple (small-channel layers stay
    # small); Cmid / Cout lane-dense for MXU tiles and unmasked output stores.
    Ci_p = _round_up(Cin, SUBLANE)
    Cm_p = _round_up(Cmid, LANE)
    Co_p = _round_up(Cout, LANE)
    Wp = _round_up(W + 2 * pad, SUBLANE)

    # Generation-aware VMEM budget (v7x: 64 MiB physical; v5e/v6e: 128 MiB).
    vmem_cap = _vmem_capacity_bytes()
    vmem_limit = int(min(vmem_cap * 3 // 4, 100 * 1024 * 1024))

    TH = _pick_tile_h(Ho, Wo, Wp, Ci_p, Cm_p, Co_p, k, stride,
                      target=tile_h, vmem_budget=int(vmem_limit * 0.6))
    n_strips = Ho // TH
    th_blk = TH * stride
    halo = k - stride
    if halo > 0 and th_blk % halo == 0:
        hb = halo                       # side-fetch exactly the borrowed rows
    elif halo > 0:
        hb = th_blk                     # fallback: whole next strip (rare)
    else:
        hb = 1                          # dummy (no halo needed)

    # Spatially padded + aligned input (bf16):
    #  * conv zero padding `pad` on top/left,
    #  * enough extra rows so every body + halo block is fully in bounds,
    #  * W rounded to a sublane multiple so in-kernel reshapes are layout-free.
    Hp = max(H + 2 * pad, n_strips * th_blk + hb)

    x = jnp.transpose(x_nchw, (0, 2, 3, 1)).astype(jnp.bfloat16)      # NHWC
    xpad = jnp.zeros((N, Hp, Wp, Ci_p), jnp.bfloat16)
    xpad = xpad.at[:, pad:pad + H, pad:pad + W, :Cin].set(x)

    # Fold BN scales into weights; matmul weights in bf16, biases stay f32.
    ib_w = _pad2(p['ib_w'] * p['ib_s'], Ci_p, Cm_p).astype(jnp.bfloat16)
    ib_b = _pad2(p['ib_b'], 1, Cm_p)
    dw_w = _pad2(p['dw_w'] * p['dw_s'], k * k, Cm_p)
    dw_b = _pad2(p['dw_b'], 1, Cm_p)
    pw_w = _pad2(p['pw_w'] * p['pw_s'], Cm_p, Co_p).astype(jnp.bfloat16)
    pw_b = _pad2(p['pw_b'], 1, Co_p)
    # Identity "embedding" used to add the residual without lane-dim padding.
    res_embed = jnp.eye(Ci_p, Co_p, dtype=jnp.float32).astype(jnp.bfloat16)

    kernel = functools.partial(
        _inv_bottleneck_kernel, k=k, stride=stride, pad=pad, H=H, W=W,
        TH=TH, Wo=Wo, residual=residual)

    x_body = pl.BlockSpec((None, th_blk, Wp, Ci_p), lambda n, h: (n, h, 0, 0))
    halo_mult = th_blk // hb
    x_halo = pl.BlockSpec((None, hb, Wp, Ci_p),
                          lambda n, h: (n, (h + 1) * halo_mult, 0, 0))

    def full(a):
        return pl.BlockSpec(a.shape, lambda n, h, _nd=a.ndim: (0,) * _nd)

    out = pl.pallas_call(
        kernel,
        out_shape=jax.ShapeDtypeStruct((N, Ho * Wo, Co_p), jnp.float32),
        grid=(N, n_strips),
        in_specs=[x_body, x_halo,
                  full(ib_w), full(ib_b),
                  full(dw_w), full(dw_b),
                  full(pw_w), full(pw_b),
                  full(res_embed)],
        out_specs=pl.BlockSpec((None, TH * Wo, Co_p), lambda n, h: (n, h, 0)),
        compiler_params=pltpu.CompilerParams(
            dimension_semantics=("parallel", "parallel"),
            vmem_limit_bytes=vmem_limit),
    )(xpad, xpad, ib_w, ib_b, dw_w, dw_b, pw_w, pw_b, res_embed)

    out = out.reshape(N, Ho, Wo, Co_p)[..., :Cout]
    return jnp.transpose(out, (0, 3, 1, 2))                  # back to NCHW


# ---------------------------------------------------------------------------
# Parameter construction (deterministic, synthetic) + pure-JAX reference
# ---------------------------------------------------------------------------
def _fold_bn(key, C):
    kg, kb, km, kv = jax.random.split(key, 4)
    gamma = 1.0 + 0.1 * jax.random.normal(kg, (C,), jnp.float32)
    beta = 0.1 * jax.random.normal(kb, (C,), jnp.float32)
    mean = 0.1 * jax.random.normal(km, (C,), jnp.float32)
    var = jax.random.uniform(kv, (C,), jnp.float32, 0.5, 1.5)
    scale = gamma / jnp.sqrt(var + 1e-5)
    bias = beta - mean * scale
    return scale.reshape(1, C), bias.reshape(1, C)


def make_params(key, Cin, Cmid, Cout, k):
    k1, k2, k3, k4, k5, k6 = jax.random.split(key, 6)
    p = {}
    p['ib_w'] = 0.1 * jax.random.normal(k1, (Cin, Cmid), jnp.float32)
    p['ib_s'], p['ib_b'] = _fold_bn(k2, Cmid)
    p['dw_w'] = 0.1 * jax.random.normal(k3, (k * k, Cmid), jnp.float32)
    p['dw_s'], p['dw_b'] = _fold_bn(k4, Cmid)
    p['pw_w'] = 0.1 * jax.random.normal(k5, (Cmid, Cout), jnp.float32)
    p['pw_s'], p['pw_b'] = _fold_bn(k6, Cout)
    return p


def reference(x_nchw, p, *, kernel_size, stride, residual):
    """Pure-JAX reference using the same folded-BN / bf16-matmul recipe as the kernel
    (depthwise conv in f32 via lax.conv)."""
    bf16, f32 = jnp.bfloat16, jnp.float32
    x = jnp.transpose(x_nchw, (0, 2, 3, 1))
    Cm = p['ib_w'].shape[1]
    ib_w = (p['ib_w'] * p['ib_s']).astype(bf16)
    dw_w = (p['dw_w'] * p['dw_s']).reshape(kernel_size, kernel_size, 1, Cm)
    pw_w = (p['pw_w'] * p['pw_s']).astype(bf16)

    y = jnp.einsum('nhwc,cd->nhwd', x.astype(bf16), ib_w, preferred_element_type=f32)
    y = jnp.clip(y + p['ib_b'][0], 0.0, 6.0)
    pad = (kernel_size - 1) // 2
    y = jax.lax.conv_general_dilated(
        y, dw_w, window_strides=(stride, stride),
        padding=[(pad, pad), (pad, pad)],
        dimension_numbers=('NHWC', 'HWIO', 'NHWC'),
        feature_group_count=Cm)
    y = jnp.clip(y + p['dw_b'][0], 0.0, 6.0)
    z = jnp.einsum('nhwc,cd->nhwd', y.astype(bf16), pw_w, preferred_element_type=f32)
    z = z + p['pw_b'][0]
    if residual:
        # The Pallas kernel streams the input in bf16, so the residual it adds is
        # the bf16-rounded input (converted back to f32 exactly via the MXU).
        z = z + x.astype(bf16).astype(f32)
    return jnp.transpose(z, (0, 3, 1, 2))


if __name__ == "__main__":
    # Small shapes consistent with the module: the residual branch requires
    # stride=1 and in_channels == out_channels.
    N, Cin, Cmid, Cout, H, W = 2, 8, 16, 8, 16, 16
    kernel_size, stride, residual = 3, 1, True

    key = jax.random.PRNGKey(0)
    kx, kp = jax.random.split(key)
    x = jax.random.normal(kx, (N, Cin, H, W), jnp.float32)
    params = make_params(kp, Cin, Cmid, Cout, kernel_size)

    out = inv_bottleneck(x, params, kernel_size=kernel_size,
                         stride=stride, residual=residual)
    out = jax.block_until_ready(out)

    ref = reference(x, params, kernel_size=kernel_size,
                    stride=stride, residual=residual)
    assert out.shape == (N, Cout, H, W), out.shape
    if not jnp.allclose(out, ref, atol=2e-3, rtol=2e-3):
        err = jnp.max(jnp.abs(out - ref))
        raise AssertionError(f"Pallas output mismatch vs. JAX reference (max |err|={err})")

    print("KERNEL_OK")
</pallas_src>

<mosaic_0001>
module attributes {stable_mosaic.version = 11 : i64} {
  func.func @_inv_bottleneck_kernel(%arg0: i32, %arg1: i32, %arg2: memref<1x8x24x8xbf16, #tpu.memory_space<vmem>>, %arg3: memref<1x2x24x8xbf16, #tpu.memory_space<vmem>>, %arg4: memref<8x128xbf16, #tpu.memory_space<vmem>>, %arg5: memref<1x128xf32, #tpu.memory_space<vmem>>, %arg6: memref<9x128xf32, #tpu.memory_space<vmem>>, %arg7: memref<1x128xf32, #tpu.memory_space<vmem>>, %arg8: memref<128x128xbf16, #tpu.memory_space<vmem>>, %arg9: memref<1x128xf32, #tpu.memory_space<vmem>>, %arg10: memref<8x128xbf16, #tpu.memory_space<vmem>>, %arg11: memref<1x128x128xf32, #tpu.memory_space<vmem>>) attributes {dimension_semantics = [#tpu.dimension_semantics<parallel>, #tpu.dimension_semantics<parallel>], iteration_bounds = array<i64: 2, 2>, scalar_prefetch = 0 : i64, scratch_operands = 0 : i64, tpu.core_type = #tpu.core_type<tc>, window_params = [{transform_indices = @transform_0, window_bounds = array<i64: 1, 8, 24, 8>}, {transform_indices = @transform_1, window_bounds = array<i64: 1, 2, 24, 8>}, {pipeline_mode = #tpu.pipeline_mode<synchronous>, transform_indices = @transform_2, window_bounds = array<i64: 8, 128>}, {pipeline_mode = #tpu.pipeline_mode<synchronous>, transform_indices = @transform_3, window_bounds = array<i64: 1, 128>}, {pipeline_mode = #tpu.pipeline_mode<synchronous>, transform_indices = @transform_4, window_bounds = array<i64: 9, 128>}, {pipeline_mode = #tpu.pipeline_mode<synchronous>, transform_indices = @transform_5, window_bounds = array<i64: 1, 128>}, {pipeline_mode = #tpu.pipeline_mode<synchronous>, transform_indices = @transform_6, window_bounds = array<i64: 128, 128>}, {pipeline_mode = #tpu.pipeline_mode<synchronous>, transform_indices = @transform_7, window_bounds = array<i64: 1, 128>}, {pipeline_mode = #tpu.pipeline_mode<synchronous>, transform_indices = @transform_8, window_bounds = array<i64: 8, 128>}, {transform_indices = @transform_9, window_bounds = array<i64: 1, 128, 128>}]} {
    %c0 = arith.constant 0 : index
    %c0_0 = arith.constant 0 : index
    %c0_1 = arith.constant 0 : index
    %c0_2 = arith.constant 0 : index
    %0 = vector.load %arg2[%c0, %c0_0, %c0_1, %c0_2] : memref<1x8x24x8xbf16, #tpu.memory_space<vmem>>, vector<1x8x24x8xbf16>
    %1 = vector.shape_cast %0 : vector<1x8x24x8xbf16> to vector<8x24x8xbf16>
    %c0_3 = arith.constant 0 : index
    %c0_4 = arith.constant 0 : index
    %c0_5 = arith.constant 0 : index
    %c0_6 = arith.constant 0 : index
    %2 = vector.load %arg3[%c0_3, %c0_4, %c0_5, %c0_6] : memref<1x2x24x8xbf16, #tpu.memory_space<vmem>>, vector<1x2x24x8xbf16>
    %3 = vector.shape_cast %2 : vector<1x2x24x8xbf16> to vector<2x24x8xbf16>
    %4 = tpu.concatenate %1, %3 in 0 : vector<8x24x8xbf16>, vector<2x24x8xbf16> -> vector<10x24x8xbf16>
    %5 = vector.shape_cast %4 : vector<10x24x8xbf16> to vector<240x8xbf16>
    %c0_7 = arith.constant 0 : index
    %c0_8 = arith.constant 0 : index
    %6 = vector.load %arg4[%c0_7, %c0_8] : memref<8x128xbf16, #tpu.memory_space<vmem>>, vector<8x128xbf16>
    %cst = arith.constant dense<0.000000e+00> : vector<240x128xf32>
    %7 = tpu.matmul %5, %6, %cst {dimension_numbers = #tpu.dot_dimension_numbers<[1], [0], [0], [1], [0, 0, 1, 1], [], []>} : vector<240x8xbf16>, vector<8x128xbf16>, vector<240x128xf32> -> vector<240x128xf32>
    %c0_9 = arith.constant 0 : index
    %c0_10 = arith.constant 0 : index
    %8 = vector.load %arg5[%c0_9, %c0_10] : memref<1x128xf32, #tpu.memory_space<vmem>>, vector<1x128xf32>
    %9 = vector.broadcast %8 : vector<1x128xf32> to vector<240x128xf32>
    %10 = arith.addf %7, %9 : vector<240x128xf32>
    %cst_11 = arith.constant 0.000000e+00 : f32
    %cst_12 = arith.constant 6.000000e+00 : f32
    %11 = vector.broadcast %cst_11 : f32 to vector<240x128xf32>
    %12 = arith.maximumf %11, %10 : vector<240x128xf32>
    %13 = vector.broadcast %cst_12 : f32 to vector<240x128xf32>
    %14 = arith.minimumf %13, %12 : vector<240x128xf32>
    %15 = vector.shape_cast %14 : vector<240x128xf32> to vector<10x24x128xf32>
    %16 = tpu.iota {dimensions = array<i32: 0>} : vector<10x24x1xi32>
    %c8_i32 = arith.constant 8 : i32
    %17 = arith.muli %arg1, %c8_i32 : i32
    %18 = vector.broadcast %17 : i32 to vector<10x24x1xi32>
    %19 = arith.addi %16, %18 : vector<10x24x1xi32>
    %20 = tpu.iota {dimensions = array<i32: 1>} : vector<10x24x1xi32>
    %c1_i32 = arith.constant 1 : i32
    %21 = vector.broadcast %c1_i32 : i32 to vector<10x24x1xi32>
    %22 = arith.cmpi sge, %19, %21 : vector<10x24x1xi32>
    %c17_i32 = arith.constant 17 : i32
    %23 = vector.broadcast %c17_i32 : i32 to vector<10x24x1xi32>
    %24 = arith.cmpi slt, %19, %23 : vector<10x24x1xi32>
    %25 = arith.andi %22, %24 : vector<10x24x1xi1>
    %c1_i32_13 = arith.constant 1 : i32
    %26 = vector.broadcast %c1_i32_13 : i32 to vector<10x24x1xi32>
    %27 = arith.cmpi sge, %20, %26 : vector<10x24x1xi32>
    %28 = arith.andi %25, %27 : vector<10x24x1xi1>
    %c17_i32_14 = arith.constant 17 : i32
    %29 = vector.broadcast %c17_i32_14 : i32 to vector<10x24x1xi32>
    %30 = arith.cmpi slt, %20, %29 : vector<10x24x1xi32>
    %31 = arith.andi %28, %30 : vector<10x24x1xi1>
    %cst_15 = arith.constant 0.000000e+00 : f32
    %32 = vector.shape_cast %31 : vector<10x24x1xi1> to vector<10x24x1xi1>
    %33 = vector.broadcast %32 : vector<10x24x1xi1> to vector<10x24x128xi1>
    %34 = vector.broadcast %cst_15 : f32 to vector<10x24x128xf32>
    %35 = arith.select %33, %15, %34 : vector<10x24x128xi1>, vector<10x24x128xf32>
    %c0_16 = arith.constant 0 : index
    %c0_17 = arith.constant 0 : index
    %36 = vector.load %arg6[%c0_16, %c0_17] : memref<9x128xf32, #tpu.memory_space<vmem>>, vector<9x128xf32>
    %37 = vector.extract_strided_slice %36 {offsets = [0, 0], sizes = [1, 128], strides = [1, 1]} : vector<9x128xf32> to vector<1x128xf32>
    %38 = vector.shape_cast %37 : vector<1x128xf32> to vector<1x1x128xf32>
    %39 = vector.extract_strided_slice %36 {offsets = [1, 0], sizes = [1, 128], strides = [1, 1]} : vector<9x128xf32> to vector<1x128xf32>
    %40 = vector.shape_cast %39 : vector<1x128xf32> to vector<1x1x128xf32>
    %41 = vector.extract_strided_slice %36 {offsets = [2, 0], sizes = [1, 128], strides = [1, 1]} : vector<9x128xf32> to vector<1x128xf32>
    %42 = vector.shape_cast %41 : vector<1x128xf32> to vector<1x1x128xf32>
    %43 = vector.extract_strided_slice %36 {offsets = [3, 0], sizes = [1, 128], strides = [1, 1]} : vector<9x128xf32> to vector<1x128xf32>
    %44 = vector.shape_cast %43 : vector<1x128xf32> to vector<1x1x128xf32>
    %45 = vector.extract_strided_slice %36 {offsets = [4, 0], sizes = [1, 128], strides = [1, 1]} : vector<9x128xf32> to vector<1x128xf32>
    %46 = vector.shape_cast %45 : vector<1x128xf32> to vector<1x1x128xf32>
    %47 = vector.extract_strided_slice %36 {offsets = [5, 0], sizes = [1, 128], strides = [1, 1]} : vector<9x128xf32> to vector<1x128xf32>
    %48 = vector.shape_cast %47 : vector<1x128xf32> to vector<1x1x128xf32>
    %49 = vector.extract_strided_slice %36 {offsets = [6, 0], sizes = [1, 128], strides = [1, 1]} : vector<9x128xf32> to vector<1x128xf32>
    %50 = vector.shape_cast %49 : vector<1x128xf32> to vector<1x1x128xf32>
    %51 = vector.extract_strided_slice %36 {offsets = [7, 0], sizes = [1, 128], strides = [1, 1]} : vector<9x128xf32> to vector<1x128xf32>
    %52 = vector.shape_cast %51 : vector<1x128xf32> to vector<1x1x128xf32>
    %53 = vector.extract_strided_slice %36 {offsets = [8, 0], sizes = [1, 128], strides = [1, 1]} : vector<9x128xf32> to vector<1x128xf32>
    %54 = vector.shape_cast %53 : vector<1x128xf32> to vector<1x1x128xf32>
    %cst_18 = arith.constant 0.000000e+00 : f32
    %55 = vector.broadcast %cst_18 : f32 to vector<8x16x128xf32>
    %56 = vector.extract_strided_slice %35 {offsets = [0, 0, 0], sizes = [8, 24, 128], strides = [1, 1, 1]} : vector<10x24x128xf32> to vector<8x24x128xf32>
    %57 = vector.extract_strided_slice %56 {offsets = [0, 0, 0], sizes = [8, 16, 128], strides = [1, 1, 1]} : vector<8x24x128xf32> to vector<8x16x128xf32>
    %58 = vector.broadcast %38 : vector<1x1x128xf32> to vector<8x16x128xf32>
    %59 = arith.mulf %57, %58 : vector<8x16x128xf32>
    %60 = arith.addf %55, %59 : vector<8x16x128xf32>
    %61 = vector.extract_strided_slice %56 {offsets = [0, 1, 0], sizes = [8, 16, 128], strides = [1, 1, 1]} : vector<8x24x128xf32> to vector<8x16x128xf32>
    %62 = vector.broadcast %40 : vector<1x1x128xf32> to vector<8x16x128xf32>
    %63 = arith.mulf %61, %62 : vector<8x16x128xf32>
    %64 = arith.addf %60, %63 : vector<8x16x128xf32>
    %65 = vector.extract_strided_slice %56 {offsets = [0, 2, 0], sizes = [8, 16, 128], strides = [1, 1, 1]} : vector<8x24x128xf32> to vector<8x16x128xf32>
    %66 = vector.broadcast %42 : vector<1x1x128xf32> to vector<8x16x128xf32>
    %67 = arith.mulf %65, %66 : vector<8x16x128xf32>
    %68 = arith.addf %64, %67 : vector<8x16x128xf32>
    %69 = vector.extract_strided_slice %35 {offsets = [1, 0, 0], sizes = [8, 24, 128], strides = [1, 1, 1]} : vector<10x24x128xf32> to vector<8x24x128xf32>
    %70 = vector.extract_strided_slice %69 {offsets = [0, 0, 0], sizes = [8, 16, 128], strides = [1, 1, 1]} : vector<8x24x128xf32> to vector<8x16x128xf32>
    %71 = vector.broadcast %44 : vector<1x1x128xf32> to vector<8x16x128xf32>
    %72 = arith.mulf %70, %71 : vector<8x16x128xf32>
    %73 = arith.addf %68, %72 : vector<8x16x128xf32>
    %74 = vector.extract_strided_slice %69 {offsets = [0, 1, 0], sizes = [8, 16, 128], strides = [1, 1, 1]} : vector<8x24x128xf32> to vector<8x16x128xf32>
    %75 = vector.broadcast %46 : vector<1x1x128xf32> to vector<8x16x128xf32>
    %76 = arith.mulf %74, %75 : vector<8x16x128xf32>
    %77 = arith.addf %73, %76 : vector<8x16x128xf32>
    %78 = vector.extract_strided_slice %69 {offsets = [0, 2, 0], sizes = [8, 16, 128], strides = [1, 1, 1]} : vector<8x24x128xf32> to vector<8x16x128xf32>
    %79 = vector.broadcast %48 : vector<1x1x128xf32> to vector<8x16x128xf32>
    %80 = arith.mulf %78, %79 : vector<8x16x128xf32>
    %81 = arith.addf %77, %80 : vector<8x16x128xf32>
    %82 = vector.extract_strided_slice %35 {offsets = [2, 0, 0], sizes = [8, 24, 128], strides = [1, 1, 1]} : vector<10x24x128xf32> to vector<8x24x128xf32>
    %83 = vector.extract_strided_slice %82 {offsets = [0, 0, 0], sizes = [8, 16, 128], strides = [1, 1, 1]} : vector<8x24x128xf32> to vector<8x16x128xf32>
    %84 = vector.broadcast %50 : vector<1x1x128xf32> to vector<8x16x128xf32>
    %85 = arith.mulf %83, %84 : vector<8x16x128xf32>
    %86 = arith.addf %81, %85 : vector<8x16x128xf32>
    %87 = vector.extract_strided_slice %82 {offsets = [0, 1, 0], sizes = [8, 16, 128], strides = [1, 1, 1]} : vector<8x24x128xf32> to vector<8x16x128xf32>
    %88 = vector.broadcast %52 : vector<1x1x128xf32> to vector<8x16x128xf32>
    %89 = arith.mulf %87, %88 : vector<8x16x128xf32>
    %90 = arith.addf %86, %89 : vector<8x16x128xf32>
    %91 = vector.extract_strided_slice %82 {offsets = [0, 2, 0], sizes = [8, 16, 128], strides = [1, 1, 1]} : vector<8x24x128xf32> to vector<8x16x128xf32>
    %92 = vector.broadcast %54 : vector<1x1x128xf32> to vector<8x16x128xf32>
    %93 = arith.mulf %91, %92 : vector<8x16x128xf32>
    %94 = arith.addf %90, %93 : vector<8x16x128xf32>
    %95 = vector.shape_cast %94 : vector<8x16x128xf32> to vector<128x128xf32>
    %c0_19 = arith.constant 0 : index
    %c0_20 = arith.constant 0 : index
    %96 = vector.load %arg7[%c0_19, %c0_20] : memref<1x128xf32, #tpu.memory_space<vmem>>, vector<1x128xf32>
    %97 = vector.broadcast %96 : vector<1x128xf32> to vector<128x128xf32>
    %98 = arith.addf %95, %97 : vector<128x128xf32>
    %cst_21 = arith.constant 0.000000e+00 : f32
    %cst_22 = arith.constant 6.000000e+00 : f32
    %99 = vector.broadcast %cst_21 : f32 to vector<128x128xf32>
    %100 = arith.maximumf %99, %98 : vector<128x128xf32>
    %101 = vector.broadcast %cst_22 : f32 to vector<128x128xf32>
    %102 = arith.minimumf %101, %100 : vector<128x128xf32>
    %103 = arith.truncf %102 : vector<128x128xf32> to vector<128x128xbf16>
    %c0_23 = arith.constant 0 : index
    %c0_24 = arith.constant 0 : index
    %104 = vector.load %arg8[%c0_23, %c0_24] : memref<128x128xbf16, #tpu.memory_space<vmem>>, vector<128x128xbf16>
    %cst_25 = arith.constant dense<0.000000e+00> : vector<128x128xf32>
    %105 = tpu.matmul %103, %104, %cst_25 {dimension_numbers = #tpu.dot_dimension_numbers<[1], [0], [0], [1], [0, 0, 1, 1], [], []>} : vector<128x128xbf16>, vector<128x128xbf16>, vector<128x128xf32> -> vector<128x128xf32>
    %c0_26 = arith.constant 0 : index
    %c0_27 = arith.constant 0 : index
    %106 = vector.load %arg9[%c0_26, %c0_27] : memref<1x128xf32, #tpu.memory_space<vmem>>, vector<1x128xf32>
    %107 = vector.broadcast %106 : vector<1x128xf32> to vector<128x128xf32>
    %108 = arith.addf %105, %107 : vector<128x128xf32>
    %109 = vector.extract_strided_slice %4 {offsets = [1, 1, 0], sizes = [8, 16, 8], strides = [1, 1, 1]} : vector<10x24x8xbf16> to vector<8x16x8xbf16>
    %110 = vector.shape_cast %109 : vector<8x16x8xbf16> to vector<128x8xbf16>
    %c0_28 = arith.constant 0 : index
    %c0_29 = arith.constant 0 : index
    %111 = vector.load %arg10[%c0_28, %c0_29] : memref<8x128xbf16, #tpu.memory_space<vmem>>, vector<8x128xbf16>
    %cst_30 = arith.constant dense<0.000000e+00> : vector<128x128xf32>
    %112 = tpu.matmul %110, %111, %cst_30 {dimension_numbers = #tpu.dot_dimension_numbers<[1], [0], [0], [1], [0, 0, 1, 1], [], []>} : vector<128x8xbf16>, vector<8x128xbf16>, vector<128x128xf32> -> vector<128x128xf32>
    %113 = arith.addf %108, %112 : vector<128x128xf32>
    %c0_31 = arith.constant 0 : index
    %c0_32 = arith.constant 0 : index
    %c0_33 = arith.constant 0 : index
    %114 = vector.load %arg11[%c0_31, %c0_32, %c0_33] : memref<1x128x128xf32, #tpu.memory_space<vmem>>, vector<1x128x128xf32>
    %115 = vector.shape_cast %114 : vector<1x128x128xf32> to vector<128x128xf32>
    %116 = vector.shape_cast %113 : vector<128x128xf32> to vector<1x128x128xf32>
    tpu.vector_store %arg11[%c0_31, %c0_32, %c0_33], %116 {strides = array<i32>} : memref<1x128x128xf32, #tpu.memory_space<vmem>>, vector<1x128x128xf32>,
    return
  }
  func.func @transform_0(%arg0: i32, %arg1: i32) -> (i32, i32, i32, i32) {
    %c0_i32 = arith.constant 0 : i32
    %c0_i32_0 = arith.constant 0 : i32
    %c0_i32_1 = arith.constant 0 : i32
    return %arg0, %arg1, %c0_i32, %c0_i32_0 : i32, i32, i32, i32
  }
  func.func @transform_1(%arg0: i32, %arg1: i32) -> (i32, i32, i32, i32) {
    %c1_i32 = arith.constant 1 : i32
    %0 = arith.addi %arg1, %c1_i32 : i32
    %c4_i32 = arith.constant 4 : i32
    %1 = arith.muli %0, %c4_i32 : i32
    %c0_i32 = arith.constant 0 : i32
    %c0_i32_0 = arith.constant 0 : i32
    %c0_i32_1 = arith.constant 0 : i32
    return %arg0, %1, %c0_i32, %c0_i32_0 : i32, i32, i32, i32
  }
  func.func @transform_2(%arg0: i32, %arg1: i32) -> (i32, i32) {
    %c0_i32 = arith.constant 0 : i32
    %c0_i32_0 = arith.constant 0 : i32
    %c0_i32_1 = arith.constant 0 : i32
    return %c0_i32, %c0_i32_0 : i32, i32
  }
  func.func @transform_3(%arg0: i32, %arg1: i32) -> (i32, i32) {
    %c0_i32 = arith.constant 0 : i32
    %c0_i32_0 = arith.constant 0 : i32
    %c0_i32_1 = arith.constant 0 : i32
    return %c0_i32, %c0_i32_0 : i32, i32
  }
  func.func @transform_4(%arg0: i32, %arg1: i32) -> (i32, i32) {
    %c0_i32 = arith.constant 0 : i32
    %c0_i32_0 = arith.constant 0 : i32
    %c0_i32_1 = arith.constant 0 : i32
    return %c0_i32, %c0_i32_0 : i32, i32
  }
  func.func @transform_5(%arg0: i32, %arg1: i32) -> (i32, i32) {
    %c0_i32 = arith.constant 0 : i32
    %c0_i32_0 = arith.constant 0 : i32
    %c0_i32_1 = arith.constant 0 : i32
    return %c0_i32, %c0_i32_0 : i32, i32
  }
  func.func @transform_6(%arg0: i32, %arg1: i32) -> (i32, i32) {
    %c0_i32 = arith.constant 0 : i32
    %c0_i32_0 = arith.constant 0 : i32
    %c0_i32_1 = arith.constant 0 : i32
    return %c0_i32, %c0_i32_0 : i32, i32
  }
  func.func @transform_7(%arg0: i32, %arg1: i32) -> (i32, i32) {
    %c0_i32 = arith.constant 0 : i32
    %c0_i32_0 = arith.constant 0 : i32
    %c0_i32_1 = arith.constant 0 : i32
    return %c0_i32, %c0_i32_0 : i32, i32
  }
  func.func @transform_8(%arg0: i32, %arg1: i32) -> (i32, i32) {
    %c0_i32 = arith.constant 0 : i32
    %c0_i32_0 = arith.constant 0 : i32
    %c0_i32_1 = arith.constant 0 : i32
    return %c0_i32, %c0_i32_0 : i32, i32
  }
  func.func @transform_9(%arg0: i32, %arg1: i32) -> (i32, i32, i32) {
    %c0_i32 = arith.constant 0 : i32
    %c0_i32_0 = arith.constant 0 : i32
    return %arg0, %arg1, %c0_i32 : i32, i32, i32
  }
}

</mosaic_0001>

<bundles_post_ra>
// kernel: tpu_custom_call.1
= control target key start
LH: loop header
LB: loop body
LE: loop exit
PB: predicated region body
PF: predicated region fallthrough
CT: control target
= control target key end

     0   :  { %s4348_s0 = inlined_call_operand.vmem [shape: bf16[2,18,24,8], index: 0, kind: input, shape index: {}]   ;;  %s4349_s1 = inlined_call_operand.vmem [shape: bf16[2,18,24,8], index: 1, kind: input, shape index: {}]   ;;  %s4350_s2 = inlined_call_operand.vmem [shape: bf16[8,128], index: 2, kind: input, shape index: {}]   ;;  %s4351_s3 = inlined_call_operand.vmem [shape: f32[1,128], index: 3, kind: input, shape index: {}]   ;;  %s4352_s4 = inlined_call_operand.vmem [shape: f32[9,128], index: 4, kind: input, shape index: {}]   ;;  %s4353_s5 = inlined_call_operand.vmem [shape: f32[1,128], index: 5, kind: input, shape index: {}]   ;;  %s4354_s6 = inlined_call_operand.vmem [shape: bf16[128,128], index: 6, kind: input, shape index: {}]   ;;  %s4355_s7 = inlined_call_operand.vmem [shape: f32[1,128], index: 7, kind: input, shape index: {}]   ;;  %s4356_s8 = inlined_call_operand.vmem [shape: bf16[8,128], index: 8, kind: input, shape index: {}]   ;;  %s4357_s9 = inlined_call_operand.hbm [shape: f32[2,256,128], index: 9, kind: output, shape index: {}]  }
   0x1   :  { %4407 = sst [smem:[#allocation49_spill]] %s4350_s2 }
   0x2   :  { %14 = vsyncpa [#allocation3], 0 }
   0x3   :  { %16 = vsyncpa [#allocation3 + $0x1], 0  ;;  %s2814_s30 = smov 0   ;;  %s2816_s10 = smov 0  }
   0x4   :  { %s2818_s11 = smov 0   ;;  %s2820_s12 = smov 0  }
   0x5   :  { %s2822_s13 = smov 0   ;;  %s2824_s14 = smov 0  }
   0x6   :  { %s2826_s15 = smov 0   ;;  %s2828_s16 = smov 0  }
   0x7 LB: > { %s2407_s17 = sadd.s32 4294967295, %s2760_s16   ;;  %s2408_s18 = sadd.s32 4294967294, %s2760_s16   ;;  %s2760_s16 = sphi %s2828_s16, %s22_s16   ;;  %s2756_s15 = sphi %s2826_s15, %s4583_s15   ;;  %s2752_s14 = sphi %s2824_s14, %s4582_s14   ;;  %s2748_s13 = sphi %s2822_s13, %s4581_s13   ;;  %s2744_s12 = sphi %s2820_s12, %s4580_s12   ;;  %s2740_s11 = sphi %s2818_s11, %s4579_s11   ;;  %s2736_s10 = sphi %s2816_s10, %s4578_s10   ;;  %s2732_s30 = sphi %s2814_s30, %s4577_s30  }
   0x8   : > { %s31_s19 = sadd.s32 1, %s2752_s14  ;;  %s34_s20 = sadd.s32 1, %s2756_s15 }
   0x9   : > { %p32_p0 = scmp.ge.s32.totalorder %s31_s19, 2  ;;  %p260_p1 = scmp.ne.s32.totalorder %s2740_s11, %s2736_s10 }
   0xa   : > { %p261_p2 = scmp.eq.s32.totalorder %s2407_s17, 3  ;;  %p266_p5 = scmp.ne.s32.totalorder %s2736_s10, %s2732_s30 }
   0xb   : > { %s4585_s19 = smov (%p32_p0, %s31_s19), 0  ;;  %s4587_s20 = smov (!%p32_p0, %s34_s20), %s2756_s15 }
   0xc   : > { %s246_s21 = ssub.s32 %s2752_s14, %s4585_s19  ;;  %p2865_p3 = por %p261_p2, %p260_p1 }
   0xd   : > { %p36_p4 = scmp.ge.s32.totalorder %s4587_s20, 2  ;;  %p267_p6 = scmp.eq.s32.totalorder %s2408_s18, 3 }
   0xe   : > { %p2413_p7 = scmp.ge.s32.totalorder %s2760_s16, 1  ;;  %p348_p9 = scmp.lt.s32.totalorder %s2760_s16, 5 }
   0xf   : > { %s4589_s20 = smov (%p36_p4, %s4587_s20), 0  ;;  %p2874_p8 = por %p267_p6, %p266_p5 }
  0x10   : > { %4409 = sst [smem:[#allocation5_spill]] %s4589_s20  ;;  %s245_s24 = ssub.s32 %s2756_s15, %s4589_s20 }
  0x11   : > { %s250_s25 = sadd.s32 1, %s2740_s11  ;;  %s247_s26 = sor.u32 %s246_s21, %s245_s24 }
  0x12   : > { %p349_p10 = pnand %p2413_p7, %p348_p9  ;;  %p248_p11 = scmp.eq.s32.totalorder %s247_s26, 0 }
  0x14   : > { %s2883_s27 = scalar_select %p248_p11, %s2740_s11, %s250_s25  }
  0x15   : > { %352 = sbr.rel (%p349_p10) target bundleno = 554 (0x22a), region = 56 }
  0x1a   : > { %s4411_s2 = sld [smem:[#allocation49_spill]]  ;;  %vm600_vm0 = vcmask 1043456   ;;  %s2889_s17 = sshll.u32 %s2744_s12, 3  ;;  %vm554_vm1 = vcmask 64512   ;;  %vm1955_vm2 = vsmask.f32 3328  ;;  %v759_v47 = vlaneseq }
  0x1b   : > { %p412_p12 = scmp.lt.s32.totalorder %s2748_s13, 1  ;;  %p414_p13 = scmp.lt.s32.totalorder %s2889_s17, 17  ;;  %vm1956_vm3 = vsmask.f32 7440  ;;  %v2150_v34 = vld [vmem:[%s4356_s8] sm:$0xf]  ;;  %v2959_v51 = vstv %s2889_s17 }
  0x1c   : > { %vm2937_vm4 = vmor %vm1955_vm2, %vm1956_vm3  ;;  %v2200_v36 = vsel %vm600_vm0, %v2150_v34, 0  ;;  %v2956_v50 = vld [vmem:[%s4351_s3] ss:$0 sm:$0xff]  ;;  %v2963_v60 = vshrl.u32 %v759_v47, 7  ;;  %vm763_vm5 = vcmp.ge.s32.totalorder %v2959_v51, 1  ;;  %vm773_vm6 = vcmp.lt.s32.totalorder %v2959_v51, 17 }
  0x1d   : > { %s413_s18 = scalar_select %p412_p12, %s2748_s13, 1  ;;  %2209 = vmatpush.bf16.msra.mxu2 %v2200_v36  ;;  %vm2974_vm7 = vmand %vm763_vm5, %vm773_vm6  ;;  %vm1033_vm14 = vcmask 1046528   ;;  %vm1155_vm15 = vcmask 1045504  }
  0x1e   : > { %s415_s21 = scalar_select %p414_p13, %s2889_s17, 17  ;;  %vm793_vm8 = vcmp.ge.s32.totalorder %v2963_v60, 1 }
  0x1f   : > { %s2584_s24 = smul.u32 54, %s413_s18  ;;  %vm2988_vm11 = vmand %vm2974_vm7, %vm793_vm8 }
  0x20   : > { %v474_v0 = vld [vmem:[%s4411_s2] sm:$0xf]  ;;  %s2583_s25 = smul.u32 3, %s415_s21  ;;  %s2573_s2 = sadd.s32 8, %s2889_s17 }
  0x21   : > { %v602_v1 = vsel %vm600_vm0, %v474_v0, 0  ;;  %p432_p0 = scmp.lt.s32.totalorder %s2573_s2, 17  ;;  %v755_v0 = vadd.s32 6, %v2959_v51 }
  0x22   : > { %611 = vmatpush.bf16.msra.mxu0 %v602_v1  ;;  %2574 = vmatpush.bf16.msra.mxu3 %v602_v1  ;;  %s418_s26 = sadd.s32 %s2584_s24, %s2583_s25 }
  0x23   : > { %s2416_s28 = sshll.u32 %s418_s26, 2  ;;  %s4591_s2 = smov (!%p432_p0, %s2573_s2), 17  ;;  %vm769_vm9 = vcmp.ge.s32.totalorder %v755_v0, 1  ;;  %vm779_vm10 = vcmp.lt.s32.totalorder %v755_v0, 17 }
  0x24   : > { %s2899_s20 = scalar_lea.vmem %s4348_s0, %s2416_s28  ;;  %s2585_s18 = smul.u32 3, %s4591_s2  ;;  %vm3011_vm12 = vmand %vm769_vm9, %vm779_vm10 }
  0x25   : > { %v2549_v2 = vld [vmem:[%s2899_s20] sm:$0xff]  ;;  %v2558_v3 = vld [vmem:[%s2899_s20 + $0x48] sm:$0xff]  ;;  %v2559_v5 = vld [vmem:[%s2899_s20 + $0x50] sm:$0xff]  ;;  %s4406_s26 = sand.u32 1, %s2736_s10  }
  0x26   : > { %2480 = vmatmul.msk.bf16.vlgmr.msra.gmra.mxu0 %vm554_vm1, %v2549_v2  ;;  %2489 = vmatmul.msk.bf16.vlgmr.msra.gmra.mxu3 %vm554_vm1, %v2558_v3  ;;  %v2550_v4 = vld [vmem:[%s2899_s20 + $0x8] sm:$0xff]  ;;  %v2551_v6 = vld [vmem:[%s2899_s20 + $0x10] sm:$0xff]  ;;  %v2560_v7 = vld [vmem:[%s2899_s20 + $0x58] sm:$0xff]  ;;  %s436_s21 = sadd.s32 %s2585_s18, %s2584_s24  ;;  %s2414_s2 = sshll.u32 %s4406_s26, 7 }
  0x27   : > { %s2419_s25 = sshll.u32 %s436_s21, 2  ;;  %v2552_v8 = vld [vmem:[%s2899_s20 + $0x18] sm:$0xff]  ;;  %v2553_v10 = vld [vmem:[%s2899_s20 + $0x20] sm:$0xff]  ;;  %v2554_v12 = vld [vmem:[%s2899_s20 + $0x28] sm:$0xff]  ;;  %s4263_s18 = scalar_lea.vmem [#allocation2], %s2414_s2 }
  0x28   : > { %s2917_s29 = scalar_lea.vmem %s4349_s1, %s2419_s25  ;;  %v2555_v14 = vld [vmem:[%s2899_s20 + $0x30] sm:$0xff]  ;;  %v447_v15 = vld [vmem:[%s2899_s20 + $0xc] sm:$0xf]  ;;  %v2556_v29 = vld [vmem:[%s2899_s20 + $0x38] sm:$0xff]  ;;  %s2537_s21 = sshll.u32 %s2744_s12, 4 }
  0x29   : > { %v2561_v9 = vld [vmem:[%s2917_s29] sm:$0xff]  ;;  %v2562_v11 = vld [vmem:[%s2917_s29 + $0x8] sm:$0xff]  ;;  %v2563_v13 = vld [vmem:[%s2917_s29 + $0x10] sm:$0xff]  ;;  %v1959_v17 = vshrl.u32 %v447_v15, 16  ;;  %v1962_v18 = vshll.u32 %v447_v15, 16  ;;  %s2298_s2 = sshll.u32 %s4263_s18, 4  ;;  %s2299_s2 = int_to_ptr.vmem [resolvable:$true] %s2298_s2 }
  0x2a   : > { %v448_v16 = vld [vmem:[%s2899_s20 + $0x10] sm:$0xf]  ;;  %v449_v25 = vld [vmem:[%s2899_s20 + $0x14] sm:$0xf]  ;;  %v450_v41 = vld [vmem:[%s2899_s20 + $0x18] sm:$0xf] }
  0x2b   : > { %v1968_v19 = vshll.u32 %v448_v16, 16  ;;  %v1972_v20 = vshrl.u32 %v448_v16, 16  ;;  %v1961_v21 = vrot.slane %v1959_v17, 4  ;;  %v1964_v22 = vrot.slane %v1962_v18, 5  ;;  %v451_v42 = vld [vmem:[%s2899_s20 + $0x1c] sm:$0xf]  ;;  %vm814_vm13 = vmand %vm3011_vm12, %vm793_vm8 }
  0x2c   : > { %v1978_v28 = vshll.u32 %v449_v25, 16  ;;  %v1983_v43 = vshrl.u32 %v450_v41, 16  ;;  %v1986_v44 = vshll.u32 %v450_v41, 16  ;;  %v1992_v45 = vshll.u32 %v451_v42, 16  ;;  %v452_v52 = vld [vmem:[%s2899_s20 + $0x20] sm:$0xf] }
  0x2d   : > { %v1970_v23 = vrot.slane %v1968_v19, 5  ;;  %v1974_v24 = vrot.slane %v1972_v20, 4  ;;  %v1965_v26 = vor.u32 %v1964_v22, %v1961_v21  ;;  %v1996_v46 = vshrl.u32 %v451_v42, 16  ;;  %v2557_v57 = vld [vmem:[%s2899_s20 + $0x40] sm:$0xff]  ;;  %s4575_s12 = sand.u32 1, %s2736_s10   ;;  %s2686_s25 = scalar_lea.hbm %s4357_s9, 512 }
  0x2e   : > { %v1980_v33 = vrot.slane %v1978_v28, 5  ;;  %v1985_v48 = vrot.slane %v1983_v43, 4  ;;  %v1988_v49 = vrot.slane %v1986_v44, 5  ;;  %v1994_v53 = vrot.slane %v1992_v45, 5  ;;  %v453_v25 = vld [vmem:[%s2899_s20 + $0x24] sm:$0xf] }
  0x2f   : > { %v1975_v27 = vor.u32 %v1974_v24, %v1970_v23  ;;  %v1966_v30 = vrot.slane %v1965_v26, 4  ;;  %v1998_v54 = vrot.slane %v1996_v46, 4  ;;  %v2002_v56 = vshll.u32 %v452_v52, 16  ;;  %v454_v26 = vld [vmem:[%s2899_s20 + $0x28] sm:$0xf] }
  0x30   : > { %v1989_v55 = vor.u32 %v1988_v49, %v1985_v48  ;;  %v3025_v28 = vadd.s32 1, %v2959_v51  ;;  %v2016_v34 = vshll.u32 %v454_v26, 16 }
  0x31   : > { %v1976_v31 = vrot.slane %v1975_v27, 4  ;;  %v1971_v35 = vsel %vm2937_vm4, %v1966_v30, %v1970_v23  ;;  %v1999_v58 = vor.u32 %v1998_v54, %v1994_v53  ;;  %v2004_v62 = vrot.slane %v2002_v56, 5 }
  0x32   : > { %v2151_v38 = vunpack.c.l.b16 %v1971_v35  ;;  %v1990_v61 = vrot.slane %v1989_v55, 4  ;;  %v3018_v23 = vadd.s32 16, %v2963_v60  ;;  %v2010_v30 = vshll.u32 %v453_v25, 16  ;;  %v468_v60 = vld [vmem:[%s2917_s29] sm:$0xf] }
  0x33   : > { %v1981_v37 = vsel %vm2937_vm4, %v1976_v31, %v1980_v33  ;;  %v2000_v1 = vrot.slane %v1999_v58, 4  ;;  %v2020_v35 = vshrl.u32 %v454_v26, 16  ;;  %vm764_vm2 = vcmp.ge.s32.totalorder %v3025_v28, 1 }
  0x34   : > { %v2152_v39 = vunpack.c.l.b16 %v1981_v37  ;;  %v1995_v2 = vsel %vm2937_vm4, %v1990_v61, %v1994_v53  ;;  %v2012_v37 = vrot.slane %v2010_v30, 5  ;;  %vm828_vm0 = vcmp.lt.s32.totalorder %v3018_v23, 17 }
  0x35   : > { %v2022_v41 = vrot.slane %v2020_v35, 4  ;;  %vm774_vm3 = vcmp.lt.s32.totalorder %v3025_v28, 17  ;;  %vm831_vm5 = vmand %vm2974_vm7, %vm828_vm0  ;;  %v3077_v26 = vadd.s32 2, %v2959_v51 }
  0x36   : > { %2481 = vmatmul.msk.bf16.gmra.mxu0 %vm554_vm1, %v2550_v4  ;;  %2490 = vmatmul.msk.bf16.gmra.mxu3 %vm554_vm1, %v2559_v5  ;;  %v2167_v40 = vpack.c.b16 %v2152_v39, %v2151_v38  ;;  %v2005_v4 = vsel %vm2937_vm4, %v2000_v1, %v2004_v62  ;;  %v2153_v5 = vunpack.c.l.b16 %v1995_v2  ;;  %v455_v39 = vld [vmem:[%s2899_s20 + $0x2c] sm:$0xf]  ;;  %vm3097_vm6 = vmand %vm764_vm2, %vm774_vm3 }
  0x37   : > { %v2026_v49 = vshll.u32 %v455_v39, 16  ;;  %vm3122_vm9 = vmand %vm3097_vm6, %vm793_vm8  ;;  %vm775_vm2 = vcmp.lt.s32.totalorder %v3077_v26, 17 }
  0x38   : > { %2528 = vmatmul.msk.bf16.vlgmr.msra.gmra.mxu2 %vm554_vm1, %v2167_v40  ;;  %v2018_v40 = vrot.slane %v2016_v34, 5 }
  0x3a   : > { %v2023_v48 = vor.u32 %v2022_v41, %v2018_v40 }
  0x46   : > { %2482 = vmatmul.msk.bf16.gmra.mxu0 %vm554_vm1, %v2551_v6  ;;  %2491 = vmatmul.msk.bf16.gmra.mxu3 %vm554_vm1, %v2560_v7  ;;  %v2982_v7 = vld [vmem:[%s4352_s4] sm:$0xff] }
  0x47   : > { %v3000_v16 = vperm.slane %v2982_v7, 2  ;;  %v3003_v17 = vperm.slane %v2982_v7, 4  ;;  %v3006_v18 = vperm.slane %v2982_v7, 5  ;;  %v3009_v19 = vperm.slane %v2982_v7, 7 }
  0x56   : > { %2483 = vmatmul.msk.bf16.gmra.mxu0 %vm554_vm1, %v2552_v8  ;;  %2492 = vmatmul.msk.bf16.gmra.mxu3 %vm554_vm1, %v2561_v9  ;;  %v2154_v8 = vunpack.c.l.b16 %v2005_v4  ;;  %v2028_v4 = vrot.slane %v2026_v49, 5 }
  0x66   : > { %2484 = vmatmul.msk.bf16.gmra.mxu0 %vm554_vm1, %v2553_v10  ;;  %2493 = vmatmul.msk.bf16.gmra.mxu3 %vm554_vm1, %v2562_v11  ;;  %v2168_v11 = vpack.c.b16 %v2154_v8, %v2153_v5 }
  0x68   : > { %2529 = vmatmul.msk.bf16.gmra.mxu2 %vm554_vm1, %v2168_v11 }
  0x76   : > { %2485 = vmatmul.msk.bf16.gmra.mxu0 %vm554_vm1, %v2554_v12  ;;  %2494 = vmatmul.msk.bf16.gmra.mxu3 %vm554_vm1, %v2563_v13  ;;  %v2993_v13 = vperm.slane %v2982_v7, 0 }
  0x86   : > { %2486 = vmatmul.msk.bf16.gmra.mxu0 %vm554_vm1, %v2555_v14  ;;  %v2996_v14 = vperm.slane %v2982_v7, 1 }
  0x96   : > { %2487 = vmatmul.msk.bf16.gmra.mxu0 %vm554_vm1, %v2556_v29  ;;  %v2007_v29 = vshrl.u32 %v453_v25, 16 }
  0x98   : > { %v2009_v36 = vrot.slane %v2007_v29, 4 }
  0x9a   : > { %v2013_v45 = vor.u32 %v2012_v37, %v2009_v36 }
  0xa3   : > { %v613_v59 = vpop.f32.mrf.mxu0 }
  0xa4   : > { %v614_v63 = vadd.f32 %v2956_v50, %v613_v59  ;;  %v2014_v59 = vrot.slane %v2013_v45, 4  ;;  %v456_v45 = vld [vmem:[%s2899_s20 + $0x30] sm:$0xf] }
  0xa6   : > { %v688_v3 = vmax.f32 %v614_v63, 0.0  ;;  %2488 = vmatmul.msk.bf16.gmra.mxu0 %vm554_vm1, %v2557_v57  ;;  %v3048_v57 = vperm.slane %v2982_v7, 3 }
  0xa8   : > { %v718_v9 = vmin.f32 %v688_v3, 6.0  ;;  %v2024_v3 = vrot.slane %v2023_v48, 4 }
  0xa9   : > { %v658_v10 = vpop.f32.mrf.mxu3 }
  0xaa   : > { %v659_v15 = vadd.f32 %v2956_v50, %v658_v10  ;;  %v919_v27 = vsel %vm2988_vm11, %v718_v9, 0.0  ;;  %v2019_v10 = vsel %vm2937_vm4, %v2014_v59, %v2018_v40  ;;  %v2029_v30 = vsel %vm2937_vm4, %v2024_v3, %v2028_v4 }
  0xab   : > { %v615_v20 = vpop.f32.mrf.mxu0  ;;  %v985_v42 = vmul.f32 %v2996_v14, %v919_v27  ;;  %v1107_v52 = vmul.f32 %v3000_v16, %v919_v27  ;;  %v952_v5 = vmul.f32 %v2993_v13, %v919_v27  ;;  %v2156_v28 = vunpack.c.l.b16 %v2029_v30 }
  0xac   : > { %v616_v22 = vadd.f32 %v2956_v50, %v615_v20  ;;  %v706_v24 = vmax.f32 %v659_v15, 0.0 }
  0xad   : > { %v1034_v61 = vrot.slane %v985_v42, 1  ;;  %v1156_v8 = vrot.slane %v1107_v52, 2  ;;  %v3104_v42 = vadd.s32 7, %v2959_v51 }
  0xae   : > { %v689_v31 = vmax.f32 %v616_v22, 0.0  ;;  %v736_v33 = vmin.f32 %v706_v24, 6.0 }
  0xaf   : > { %vm770_vm10 = vcmp.ge.s32.totalorder %v3104_v42, 1  ;;  %vm780_vm11 = vcmp.lt.s32.totalorder %v3104_v42, 17 }
  0xb0   : > { %v719_v38 = vmin.f32 %v689_v31, 6.0  ;;  %v3034_v43 = vsel %vm814_vm13, %v736_v33, 0.0  ;;  %v2155_v31 = vunpack.c.l.b16 %v2019_v10  ;;  %vm765_vm13 = vcmp.ge.s32.totalorder %v3077_v26, 1 }
  0xb1   : > { %4420 = vst [vmem:[#allocation6_spill] sm:$0xff] %v3034_v43  ;;  %v660_v44 = vpop.f32.mrf.mxu3  ;;  %v3053_v0 = vmul.f32 %v2996_v14, %v3034_v43  ;;  %v3066_v15 = vmul.f32 %v3000_v16, %v3034_v43 }
  0xb2   : > { %v920_v46 = vsel %vm2974_vm7, %v719_v38, 0.0  ;;  %v661_v47 = vadd.f32 %v2956_v50, %v660_v44  ;;  %v2571_v44 = vld [vmem:[%s4354_s6 + $0x38] sm:$0xff]  ;;  %vm849_vm7 = vmand %vm3011_vm12, %vm828_vm0 }
  0xb3   : > { %v986_v53 = vmul.f32 %v2996_v14, %v920_v46  ;;  %v3043_v54 = vmul.f32 %v3000_v16, %v920_v46  ;;  %v618_v55 = vpop.f32.mrf.mxu0  ;;  %4421 = vst [vmem:[#allocation7_spill] sm:$0xff] %v3053_v0  ;;  %v953_v11 = vmul.f32 %v2993_v13, %v920_v46  ;;  %1906 = vmatpush.bf16.msra.mxu1 %v2571_v44 }
  0xb4   : > { %v619_v56 = vadd.f32 %v2956_v50, %v618_v55  ;;  %v707_v58 = vmax.f32 %v661_v47, 0.0  ;;  %4422 = vst [vmem:[#allocation8_spill] sm:$0xff] %v3066_v15  ;;  %v2031_v55 = vshrl.u32 %v456_v45, 16  ;;  %2575 = vmatpush.bf16.msrb.mxu3 %v2571_v44 }
  0xb5   : > { %v1035_v62 = vrot.slane %v986_v53, 1  ;;  %v1157_v63 = vrot.slane %v3043_v54, 2  ;;  %v3115_v53 = vld [vmem:[%s2899_s20 + $0x34] sm:$0xf] }
  0xb6   : > { %v690_v1 = vmax.f32 %v619_v56, 0.0  ;;  %v737_v2 = vmin.f32 %v707_v58, 6.0  ;;  %v2034_v56 = vshll.u32 %v456_v45, 16  ;;  %v2040_v10 = vshll.u32 %v3115_v53, 16 }
  0xb7   : > { %v1036_v9 = vsel %vm1033_vm14, %v1034_v61, %v1035_v62  ;;  %v1158_v6 = vsel %vm1155_vm15, %v1156_v8, %v1157_v63 }
  0xb8   : > { %v720_v12 = vmin.f32 %v690_v1, 6.0  ;;  %v3070_v20 = vsel %vm3011_vm12, %v737_v2, 0.0  ;;  %v1090_v22 = vadd.f32 %v1036_v9, %v952_v5  ;;  %v2169_v1 = vpack.c.b16 %v2156_v28, %v2155_v31  ;;  %vm3195_vm12 = vmand %vm770_vm10, %vm780_vm11 }
  0xb9   : > { %4423 = vst [vmem:[#allocation9_spill] sm:$0xff] %v3070_v20  ;;  %v663_v25 = vpop.f32.mrf.mxu3  ;;  %v3086_v36 = vmul.f32 %v2996_v14, %v3070_v20  ;;  %v3090_v37 = vmul.f32 %v3000_v16, %v3070_v20  ;;  %v965_v41 = vmul.f32 %v2993_v13, %v3070_v20  ;;  %vm817_vm3 = vmand %vm3195_vm12, %vm793_vm8 }
  0xba   : > { %v921_v27 = vsel %vm831_vm5, %v720_v12, 0.0  ;;  %v664_v29 = vadd.f32 %v2956_v50, %v663_v25  ;;  %v1212_v46 = vadd.f32 %v1158_v6, %v1090_v22  ;;  %2530 = vmatmul.msk.bf16.gmra.mxu2 %vm554_vm1, %v2169_v1  ;;  %v2036_v6 = vrot.slane %v2034_v56, 5  ;;  %vm834_vm5 = vmand %vm3097_vm6, %vm828_vm0 }
  0xbb   : > { %v987_v33 = vmul.f32 %v2996_v14, %v921_v27  ;;  %v1109_v34 = vmul.f32 %v3000_v16, %v921_v27  ;;  %v620_v35 = vpop.f32.mrf.mxu0  ;;  %4424 = vst [vmem:[#allocation10_spill] sm:$0xff] %v3086_v36  ;;  %v4360_v21 = vrot.slane %v3086_v36, 1  ;;  %v4359_v61 = vrot.slane %v3090_v37, 2 }
  0xbc   : > { %4425 = vst [vmem:[#allocation11_spill] sm:$0xff] %v3090_v37  ;;  %v621_v38 = vadd.f32 %v2956_v50, %v620_v35  ;;  %v708_v40 = vmax.f32 %v664_v29, 0.0  ;;  %v2569_v35 = vld [vmem:[%s4354_s6 + $0x28] sm:$0xff] }
  0xbd   : > { %v1037_v47 = vrot.slane %v987_v33, 1  ;;  %v1159_v48 = vrot.slane %v1109_v34, 2 }
  0xbe   : > { %v691_v49 = vmax.f32 %v621_v38, 0.0  ;;  %v738_v52 = vmin.f32 %v708_v40, 6.0 }
  0xbf   : > { %v1038_v58 = vsel %vm1033_vm14, %v1035_v62, %v1037_v47  ;;  %v2570_v62 = vld [vmem:[%s4354_s6 + $0x30] sm:$0xff]  ;;  %v1160_v12 = vsel %vm1155_vm15, %v1157_v63, %v1159_v48 }
  0xc0   : > { %v721_v2 = vmin.f32 %v691_v49, 6.0  ;;  %v3128_v3 = vsel %vm849_vm7, %v738_v52, 0.0  ;;  %v1091_v4 = vadd.f32 %v1038_v58, %v953_v11  ;;  %1907 = vmatpush.bf16.msra.mxu1 %v2570_v62  ;;  %v2033_v11 = vrot.slane %v2031_v55, 4  ;;  %2576 = vmatpush.bf16.msrb.mxu3 %v2570_v62  ;;  %vm3295_vm7 = vmand %vm3195_vm12, %vm828_vm0 }
  0xc1   : > { %4430 = vst [vmem:[#allocation12_spill] sm:$0xff] %v3128_v3  ;;  %v1005_v5 = vmul.f32 %v2996_v14, %v3128_v3  ;;  %v1127_v8 = vmul.f32 %v3000_v16, %v3128_v3  ;;  %v665_v9 = vpop.f32.mrf.mxu3  ;;  %v3154_v30 = vmul.f32 %v3003_v17, %v3128_v3  ;;  %v3158_v54 = vmul.f32 %v3006_v18, %v3128_v3 }
  0xc2   : > { %v922_v22 = vsel %vm3122_vm9, %v721_v2, 0.0  ;;  %v666_v34 = vadd.f32 %v2956_v50, %v665_v9  ;;  %v1213_v38 = vadd.f32 %v1160_v12, %v1091_v4  ;;  %v3178_v49 = vmul.f32 %v3009_v19, %v3128_v3 }
  0xc3   : > { %v3147_v25 = vmul.f32 %v2996_v14, %v922_v22  ;;  %v3150_v27 = vmul.f32 %v3000_v16, %v922_v22  ;;  %v623_v29 = vpop.f32.mrf.mxu0  ;;  %4431 = vst [vmem:[#allocation13_spill] sm:$0xff] %v3154_v30  ;;  %v1229_v63 = vmul.f32 %v3048_v57, %v922_v22  ;;  %v1067_v33 = vrot.slane %v1005_v5, 1 }
  0xc4   : > { %4432 = vst [vmem:[#allocation14_spill] sm:$0xff] %v3158_v54  ;;  %v624_v31 = vadd.f32 %v2956_v50, %v623_v29  ;;  %v3167_v40 = vmul.f32 %v3003_v17, %v922_v22  ;;  %v3170_v44 = vmul.f32 %v3006_v18, %v922_v22  ;;  %v1189_v45 = vrot.slane %v1127_v8, 2  ;;  %1908 = vmatpush.bf16.msra.mxu1 %v2569_v35  ;;  %v2565_v8 = vld [vmem:[%s4354_s6 + $0x8] sm:$0xff] }
  0xc5   : > { %v954_v47 = vmul.f32 %v2993_v13, %v922_v22  ;;  %v1068_v28 = vsel %vm1033_vm14, %v4360_v21, %v1067_v33  ;;  %4433 = vst [vmem:[#allocation15_spill] sm:$0xff] %v3178_v49  ;;  %2577 = vmatpush.bf16.msrb.mxu3 %v2569_v35  ;;  %v1039_v52 = vrot.slane %v3147_v25, 1  ;;  %v1161_v55 = vrot.slane %v3150_v27, 2 }
  0xc6   : > { %v692_v48 = vmax.f32 %v624_v31, 0.0  ;;  %v3182_v56 = vadd.f32 %v1068_v28, %v965_v41  ;;  %v3187_v58 = vsel %vm1155_vm15, %v4359_v61, %v1189_v45  ;;  %v3189_v59 = vadd.f32 %v1229_v63, %v1212_v46  ;;  %v2568_v41 = vld [vmem:[%s4354_s6 + $0x20] sm:$0xff]  ;;  %v458_v31 = vld [vmem:[%s2899_s20 + $0x38] sm:$0xf] }
  0xc7   : > { %4435 = vst [vmem:[#allocation17_spill] sm:$0xff] %v3187_v58  ;;  %v709_v2 = vmax.f32 %v666_v34, 0.0  ;;  %v2037_v4 = vor.u32 %v2036_v6, %v2033_v11  ;;  %v2044_v33 = vshrl.u32 %v3115_v53, 16  ;;  %v2567_v28 = vld [vmem:[%s4354_s6 + $0x18] sm:$0xff]  ;;  %v2050_v9 = vshll.u32 %v458_v31, 16 }
  0xc8   : > { %4434 = vst [vmem:[#allocation16_spill] sm:$0xff] %v3182_v56  ;;  %v722_v1 = vmin.f32 %v692_v48, 6.0  ;;  %1909 = vmatpush.bf16.msra.mxu1 %v2568_v41 }
  0xc9   : > { %v668_v42 = vpop.f32.mrf.mxu3  ;;  %v739_v11 = vmin.f32 %v709_v2, 6.0  ;;  %2578 = vmatpush.bf16.msrb.mxu3 %v2568_v41  ;;  %v2038_v48 = vrot.slane %v2037_v4, 4  ;;  %v2046_v53 = vrot.slane %v2044_v33, 4 }
  0xca   : > { %v923_v12 = vsel %vm3097_vm6, %v722_v1, 0.0  ;;  %v669_v6 = vadd.f32 %v2956_v50, %v668_v42  ;;  %v2042_v42 = vrot.slane %v2040_v10, 5  ;;  %vm3282_vm6 = vmand %vm765_vm13, %vm775_vm2 }
  0xcb   : > { %v3213_v25 = vmul.f32 %v2996_v14, %v923_v12  ;;  %v3216_v27 = vmul.f32 %v3000_v16, %v923_v12  ;;  %v1230_v29 = vmul.f32 %v3048_v57, %v923_v12  ;;  %v625_v63 = vpop.f32.mrf.mxu0  ;;  %v3226_v34 = vmul.f32 %v3003_v17, %v923_v12  ;;  %vm802_vm10 = vmand %vm3282_vm6, %vm793_vm8 }
  0xcc   : > { %v3229_v35 = vmul.f32 %v3006_v18, %v923_v12  ;;  %v626_v45 = vadd.f32 %v2956_v50, %v625_v63  ;;  %v710_v41 = vmax.f32 %v669_v6, 0.0  ;;  %v955_v61 = vmul.f32 %v2993_v13, %v923_v12  ;;  %1910 = vmatpush.bf16.msra.mxu1 %v2567_v28 }
  0xcd   : > { %v1040_v1 = vrot.slane %v3213_v25, 1  ;;  %v1162_v2 = vrot.slane %v3216_v27, 2  ;;  %v3240_v21 = vsel %vm817_vm3, %v739_v11, 0.0  ;;  %2579 = vmatpush.bf16.msrb.mxu3 %v2567_v28  ;;  %v3243_v63 = vadd.f32 %v1230_v29, %v1213_v38  ;;  %v2566_v38 = vld [vmem:[%s4354_s6 + $0x10] sm:$0xff] }
  0xce   : > { %v693_v24 = vmax.f32 %v626_v45, 0.0  ;;  %4438 = vst [vmem:[#allocation18_spill] sm:$0xff] %v3240_v21  ;;  %v740_v6 = vmin.f32 %v710_v41, 6.0  ;;  %v4361_v10 = vrot.slane %v3226_v34, 1  ;;  %v4362_v12 = vrot.slane %v3229_v35, 2 }
  0xcf   : > { %v1041_v4 = vsel %vm1033_vm14, %v1039_v52, %v1040_v1  ;;  %v2043_v25 = vsel %vm2937_vm4, %v2038_v48, %v2042_v42  ;;  %v3261_v39 = vsel %vm1155_vm15, %v1161_v55, %v1162_v2 }
  0xd0   : > { %v723_v11 = vmin.f32 %v693_v24, 6.0  ;;  %v3256_v52 = vadd.f32 %v1041_v4, %v954_v47  ;;  %v3265_v29 = vsel %vm3195_vm12, %v740_v6, 0.0  ;;  %v757_v24 = vadd.s32 8, %v2959_v51  ;;  %1911 = vmatpush.bf16.msra.mxu1 %v2566_v38 }
  0xd1   : > { %4439 = vst [vmem:[#allocation19_spill] sm:$0xff] %v3265_v29  ;;  %v670_v31 = vpop.f32.mrf.mxu3  ;;  %v3271_v48 = vmul.f32 %v2996_v14, %v3265_v29  ;;  %v2047_v47 = vor.u32 %v2046_v53, %v2042_v42  ;;  %2580 = vmatpush.bf16.msrb.mxu3 %v2566_v38  ;;  %v2052_v53 = vrot.slane %v2050_v9, 5  ;;  %v3286_v38 = vunpack.c.l.b16 %v2043_v25 }
  0xd2   : > { %v924_v33 = vsel %vm834_vm5, %v723_v11, 0.0  ;;  %v671_v45 = vadd.f32 %v2956_v50, %v670_v31  ;;  %vm771_vm9 = vcmp.ge.s32.totalorder %v757_v24, 1  ;;  %vm781_vm11 = vcmp.lt.s32.totalorder %v757_v24, 17  ;;  %vm837_vm5 = vmand %vm3282_vm6, %vm828_vm0 }
  0xd3   : > { %v990_v55 = vmul.f32 %v2996_v14, %v924_v33  ;;  %v1112_v28 = vmul.f32 %v3000_v16, %v924_v33  ;;  %v1264_v41 = vmul.f32 %v3003_v17, %v924_v33  ;;  %v1385_v4 = vmul.f32 %v3006_v18, %v924_v33  ;;  %v628_v6 = vpop.f32.mrf.mxu0  ;;  %vm3358_vm12 = vmand %vm771_vm9, %vm781_vm11 }
  0xd4   : > { %v629_v11 = vadd.f32 %v2956_v50, %v628_v6  ;;  %v711_v42 = vmax.f32 %v671_v45, 0.0  ;;  %v3300_v45 = vadd.s32 3, %v2959_v51  ;;  %1912 = vmatpush.bf16.msra.mxu1 %v2565_v8  ;;  %v2048_v62 = vrot.slane %v2047_v47, 4  ;;  %vm820_vm13 = vmand %vm3358_vm12, %vm793_vm8 }
  0xd5   : > { %v1042_v33 = vrot.slane %v990_v55, 1  ;;  %v1313_v22 = vrot.slane %v1264_v41, 1  ;;  %v1164_v9 = vrot.slane %v1112_v28, 2  ;;  %2581 = vmatpush.bf16.msrb.mxu3 %v2565_v8  ;;  %v1434_v41 = vrot.slane %v1385_v4, 2  ;;  %v2564_v8 = vld [vmem:[%s4354_s6] sm:$0xff]  ;;  %vm855_vm9 = vmand %vm3358_vm12, %vm828_vm0 }
  0xd6   : > { %v694_v25 = vmax.f32 %v629_v11, 0.0  ;;  %v741_v6 = vmin.f32 %v711_v42, 6.0  ;;  %v2053_v46 = vsel %vm2937_vm4, %v2048_v62, %v2052_v53  ;;  %v4452_v53 = vrot.slane %v3271_v48, 1 }
  0xd7   : > { %v1043_v55 = vsel %vm1033_vm14, %v1040_v1, %v1042_v33  ;;  %v1314_v28 = vsel %vm1033_vm14, %v4361_v10, %v1313_v22  ;;  %v1165_v33 = vsel %vm1155_vm15, %v1162_v2, %v1164_v9  ;;  %v3350_v27 = vsel %vm1155_vm15, %v4362_v12, %v1434_v41 }
  0xd8   : > { %v1093_v5 = vadd.f32 %v1043_v55, %v955_v61  ;;  %v724_v11 = vmin.f32 %v694_v25, 6.0  ;;  %v3313_v42 = vsel %vm3295_vm7, %v741_v6, 0.0  ;;  %1913 = vmatpush.bf16.msra.mxu1 %v2564_v8  ;;  %v3345_v10 = vadd.f32 %v1314_v28, %v3243_v63 }
  0xd9   : > { %4444 = vst [vmem:[#allocation20_spill] sm:$0xff] %v3313_v42  ;;  %v1008_v1 = vmul.f32 %v2996_v14, %v3313_v42  ;;  %v3322_v47 = vmul.f32 %v3000_v16, %v3313_v42  ;;  %v3326_v61 = vmul.f32 %v3003_v17, %v3313_v42  ;;  %v3330_v22 = vmul.f32 %v3006_v18, %v3313_v42  ;;  %v673_v4 = vpop.f32.mrf.mxu3 }
  0xda   : > { %v3335_v26 = vsel %vm802_vm10, %v724_v11, 0.0  ;;  %v3339_v25 = vmul.f32 %v3009_v19, %v3313_v42  ;;  %v674_v6 = vadd.f32 %v2956_v50, %v673_v4  ;;  %2582 = vmatpush.bf16.msrb.mxu3 %v2564_v8  ;;  %v3342_v55 = vadd.f32 %v1165_v33, %v1093_v5  ;;  %v459_v5 = vld [vmem:[%s2899_s20 + $0x3c] sm:$0xf]  ;;  %v460_v4 = vld [vmem:[%s2899_s20 + $0x40] sm:$0xf] }
  0xdb   : > { %4445 = vst [vmem:[#allocation21_spill] sm:$0xff] %v3326_v61  ;;  %v3354_v2 = vmul.f32 %v2996_v14, %v3335_v26  ;;  %v630_v9 = vpop.f32.mrf.mxu0  ;;  %v3365_v63 = vmul.f32 %v3000_v16, %v3335_v26  ;;  %v1072_v41 = vrot.slane %v1008_v1, 1  ;;  %v2158_v1 = vunpack.c.l.b16 %v2053_v46 }
  0xdc   : > { %4446 = vst [vmem:[#allocation22_spill] sm:$0xff] %v3330_v22  ;;  %v631_v28 = vadd.f32 %v2956_v50, %v630_v9  ;;  %v712_v24 = vmax.f32 %v674_v6, 0.0  ;;  %v2055_v9 = vshrl.u32 %v459_v5, 16  ;;  %v2058_v56 = vshll.u32 %v459_v5, 16  ;;  %v461_v22 = vld [vmem:[%s2899_s20 + $0x44] sm:$0xf] }
  0xdd   : > { %4447 = vst [vmem:[#allocation23_spill] sm:$0xff] %v3339_v25  ;;  %v2064_v33 = vshll.u32 %v460_v4, 16  ;;  %v2068_v61 = vshrl.u32 %v460_v4, 16  ;;  %v3383_v62 = vsel %vm1033_vm14, %v4452_v53, %v1072_v41  ;;  %vm766_vm2 = vcmp.ge.s32.totalorder %v3300_v45, 1 }
  0xde   : > { %4448 = vst [vmem:[#allocation24_spill] sm:$0xff] %v3354_v2  ;;  %v695_v37 = vmax.f32 %v631_v28, 0.0  ;;  %v742_v8 = vmin.f32 %v712_v24, 6.0  ;;  %v2170_v28 = vpack.c.b16 %v2158_v1, %v3286_v38  ;;  %v2057_v24 = vrot.slane %v2055_v9, 4 }
  0xdf   : > { %4451 = vst [vmem:[#allocation25_spill] sm:$0xff] %v3365_v63  ;;  %v2060_v5 = vrot.slane %v2058_v56, 5  ;;  %v3390_v15 = vrot.slane %v2064_v33, 5  ;;  %vm776_vm3 = vcmp.lt.s32.totalorder %v3300_v45, 17  ;;  %v2074_v53 = vshll.u32 %v461_v22, 16 }
  0xe0   : > { %v725_v12 = vmin.f32 %v695_v37, 6.0  ;;  %v3386_v58 = vsel %vm820_vm13, %v742_v8, 0.0  ;;  %2531 = vmatmul.msk.bf16.gmra.mxu2 %vm554_vm1, %v2170_v28  ;;  %v2070_v8 = vrot.slane %v2068_v61, 4  ;;  %v4457_v6 = vrot.slane %v3226_v34, 1 }
  0xe1   : > { %4453 = vst [vmem:[#allocation26_spill] sm:$0xff] %v3386_v58  ;;  %v675_v46 = vpop.f32.mrf.mxu3  ;;  %v3398_v41 = vmul.f32 %v3003_v17, %v3386_v58  ;;  %v3402_v38 = vmul.f32 %v3006_v18, %v3386_v58  ;;  %v3415_v33 = vmul.f32 %v3009_v19, %v3386_v58  ;;  %v3421_v61 = vmul.f32 %v3048_v57, %v3386_v58 }
  0xe2   : > { %v3394_v37 = vsel %vm3282_vm6, %v725_v12, 0.0  ;;  %v676_v9 = vadd.f32 %v2956_v50, %v675_v46  ;;  %v2061_v0 = vor.u32 %v2060_v5, %v2057_v24  ;;  %v4458_v24 = vrot.slane %v3167_v40, 1  ;;  %vm3483_vm6 = vmand %vm766_vm2, %vm776_vm3 }
  0xe3   : > { %v633_v4 = vpop.f32.mrf.mxu0  ;;  %v3407_v56 = vmul.f32 %v2996_v14, %v3394_v37  ;;  %v3411_v12 = vmul.f32 %v3000_v16, %v3394_v37  ;;  %4456 = vst [vmem:[#allocation29_spill] sm:$0xff] %v3415_v33  ;;  %v957_v28 = vmul.f32 %v2993_v13, %v3394_v37  ;;  %v4459_v22 = vrot.slane %v3229_v35, 2  ;;  %vm805_vm7 = vmand %vm3483_vm6, %vm793_vm8 }
  0xe4   : > { %v634_v1 = vadd.f32 %v2956_v50, %v633_v4  ;;  %v713_v54 = vmax.f32 %v676_v9, 0.0  ;;  %v2071_v4 = vor.u32 %v2070_v8, %v3390_v15  ;;  %v2062_v58 = vrot.slane %v2061_v0, 4  ;;  %vm840_vm10 = vmand %vm3483_vm6, %vm828_vm0 }
  0xe5   : > { %4454 = vst [vmem:[#allocation27_spill] sm:$0xff] %v3407_v56  ;;  %v1312_v5 = vsel %vm1033_vm14, %v4458_v24, %v4457_v6  ;;  %v2076_v8 = vrot.slane %v2074_v53, 5  ;;  %v4460_v0 = vrot.slane %v3170_v44, 2  ;;  %v1488_v40 = vadd.f32 %v3350_v27, %v3345_v10 }
  0xe6   : > { %4455 = vst [vmem:[#allocation28_spill] sm:$0xff] %v3411_v12  ;;  %v696_v36 = vmax.f32 %v634_v1, 0.0  ;;  %v743_v9 = vmin.f32 %v713_v54, 6.0  ;;  %v2072_v25 = vrot.slane %v2071_v4, 4  ;;  %v2067_v31 = vsel %vm2937_vm4, %v2062_v58, %v3390_v15 }
  0xe7   : > { %v1366_v42 = vadd.f32 %v1312_v5, %v3189_v59  ;;  %v1433_v34 = vsel %vm1155_vm15, %v4460_v0, %v4459_v22  ;;  %v3455_v54 = vperm.slane %v2982_v7, 6  ;;  %v3459_v15 = vmul.f32 %v3009_v19, %v3335_v26 }
  0xe8   : > { %v726_v1 = vmin.f32 %v696_v36, 6.0  ;;  %v3463_v58 = vmul.f32 %v3009_v19, %v3394_v37  ;;  %v3489_v22 = vsel %vm3358_vm12, %v743_v9, 0.0  ;;  %v2077_v24 = vsel %vm2937_vm4, %v2072_v25, %v2076_v8 }
  0xe9   : > { %v678_v36 = vpop.f32.mrf.mxu3  ;;  %4463 = vst [vmem:[#allocation30_spill] sm:$0xff] %v3489_v22  ;;  %v3502_v46 = vmul.f32 %v3048_v57, %v3489_v22  ;;  %v3506_v9 = vmul.f32 %v3006_v18, %v3489_v22  ;;  %v4464_v25 = vrot.slane %v3407_v56, 1  ;;  %v2160_v3 = vunpack.c.l.b16 %v2077_v24  ;;  %v3549_v24 = vld [vmem:[%s4352_s4 + $0x8] ss:$0 sm:$0xff] }
  0xea   : > { %v3452_v6 = vsel %vm837_vm5, %v726_v1, 0.0  ;;  %v679_v10 = vadd.f32 %v2956_v50, %v678_v36  ;;  %v3497_v36 = vmul.f32 %v3003_v17, %v3489_v22  ;;  %v1129_v4 = vmul.f32 %v3000_v16, %v3265_v29 }
  0xeb   : > { %v993_v44 = vmul.f32 %v2996_v14, %v3452_v6  ;;  %v1115_v59 = vmul.f32 %v3000_v16, %v3452_v6  ;;  %v3471_v35 = vmul.f32 %v3003_v17, %v3452_v6  ;;  %v635_v7 = vpop.f32.mrf.mxu0  ;;  %v3476_v27 = vmul.f32 %v3006_v18, %v3452_v6 }
  0xec   : > { %v636_v53 = vadd.f32 %v2956_v50, %v635_v7  ;;  %v1539_v0 = vmul.f32 %v3009_v19, %v3452_v6  ;;  %v714_v45 = vmax.f32 %v679_v10, 0.0 }
  0xed   : > { %v1047_v5 = vrot.slane %v993_v44, 1  ;;  %v1169_v1 = vrot.slane %v1115_v59, 2  ;;  %v4465_v44 = vrot.slane %v3411_v12, 2 }
  0xee   : > { %v697_v7 = vmax.f32 %v636_v53, 0.0  ;;  %v3522_v53 = vmul.f32 %v3009_v19, %v3489_v22  ;;  %v744_v49 = vmin.f32 %v714_v45, 6.0 }
  0xef   : > { %v1048_v8 = vsel %vm1033_vm14, %v4464_v25, %v1047_v5  ;;  %v3514_v59 = vsel %vm1155_vm15, %v4465_v44, %v1169_v1  ;;  %v2159_v1 = vunpack.c.l.b16 %v2067_v31  ;;  %v1588_v25 = vrot.slane %v1539_v0, 1 }
  0xf0   : > { %4466 = vst [vmem:[#allocation31_spill] sm:$0xff] %v3514_v59  ;;  %v3524_v33 = vadd.f32 %v1048_v8, %v957_v28  ;;  %v727_v5 = vmin.f32 %v697_v7, 6.0  ;;  %v1504_v28 = vmul.f32 %v3455_v54, %v3335_v26  ;;  %v1505_v7 = vmul.f32 %v3455_v54, %v3394_v37 }
  0xf1   : > { %4467 = vst [vmem:[#allocation32_spill] sm:$0xff] %v3522_v53  ;;  %v3544_v8 = vsel %vm855_vm9, %v744_v49, 0.0  ;;  %v2171_v45 = vpack.c.b16 %v2160_v3, %v2159_v1  ;;  %v1487_v44 = vadd.f32 %v1433_v34, %v1366_v42  ;;  %v1585_v3 = vrot.slane %v3459_v15, 1 }
  0xf2   : > { %4468 = vst [vmem:[#allocation33_spill] sm:$0xff] %v3524_v33  ;;  %v3532_v20 = vsel %vm805_vm7, %v727_v5, 0.0  ;;  %v1285_v30 = vmul.f32 %v3003_v17, %v3544_v8  ;;  %v3556_v10 = vmul.f32 %v3006_v18, %v3544_v8  ;;  %v3565_v53 = vmul.f32 %v3009_v19, %v3544_v8 }
  0xf3   : > { %v3541_v11 = vmul.f32 %v2996_v14, %v3532_v20  ;;  %v638_v0 = vpop.f32.mrf.mxu0  ;;  %4470 = vst [vmem:[#allocation35_spill] sm:$0xff] %v3544_v8  ;;  %v3561_v49 = vmul.f32 %v3000_v16, %v3532_v20  ;;  %2532 = vmatmul.msk.bf16.gmra.mxu2 %vm554_vm1, %v2171_v45  ;;  %v1520_v22 = vadd.f32 %v1504_v28, %v1487_v44  ;;  %v1586_v34 = vrot.slane %v3463_v58, 1  ;;  %v680_v8 = vpop.f32.mrf.mxu3 }
  0xf4   : > { %v639_v5 = vadd.f32 %v2956_v50, %v638_v0  ;;  %4472 = vst [vmem:[#allocation37_spill] sm:$0xff] %v3565_v53  ;;  %v1348_v0 = vrot.slane %v1285_v30, 1  ;;  %v1521_v43 = vadd.f32 %v1505_v7, %v1488_v40  ;;  %v1658_v31 = vmul.f32 %v3549_v24, %v3335_v26 }
  0xf5   : > { %4469 = vst [vmem:[#allocation34_spill] sm:$0xff] %v3541_v11  ;;  %v4473_v45 = vrot.slane %v3497_v36, 1  ;;  %v1660_v30 = vmul.f32 %v3549_v24, %v3452_v6  ;;  %v681_v40 = vadd.f32 %v2956_v50, %v680_v8  ;;  %v1587_v58 = vsel %vm1033_vm14, %v1585_v3, %v1586_v34 }
  0xf6   : > { %4471 = vst [vmem:[#allocation36_spill] sm:$0xff] %v3561_v49  ;;  %v698_v1 = vmax.f32 %v639_v5, 0.0  ;;  %v1659_v49 = vmul.f32 %v3549_v24, %v3394_v37  ;;  %v1589_v44 = vsel %vm1033_vm14, %v1586_v34, %v1588_v25  ;;  %v1706_v28 = vrot.slane %v1658_v31, 2 }
  0xf7   : > { %v3578_v15 = vsel %vm1033_vm14, %v4473_v45, %v1348_v0  ;;  %v1642_v42 = vadd.f32 %v1589_v44, %v1521_v43  ;;  %v1709_v11 = vrot.slane %v1660_v30, 2  ;;  %v3592_v0 = vld [vmem:[%s4353_s5] ss:$0 sm:$0xff]  ;;  %v715_v3 = vmax.f32 %v681_v40, 0.0 }
  0xf8   : > { %v728_v53 = vmin.f32 %v698_v1, 6.0  ;;  %v1707_v7 = vrot.slane %v1659_v49, 2  ;;  %v1641_v1 = vadd.f32 %v1587_v58, %v1520_v22  ;;  %4474 = vst [vmem:[#allocation38_spill] sm:$0xff] %v3592_v0  ;;  %v758_v58 = vadd.s32 9, %v2959_v51 }
  0xf9   : > { %v745_v33 = vmin.f32 %v715_v3, 6.0  ;;  %v4480_v3 = vrot.slane %v3506_v9, 2 }
  0xfa   : > { %v3587_v5 = vsel %vm3483_vm6, %v728_v53, 0.0  ;;  %v1708_v43 = vsel %vm1155_vm15, %v1706_v28, %v1707_v7  ;;  %v1710_v31 = vsel %vm1155_vm15, %v1707_v7, %v1709_v11  ;;  %v966_v28 = vmul.f32 %v2993_v13, %v3240_v21 }
  0xfb   : > { %v640_v6 = vpop.f32.mrf.mxu0  ;;  %v959_v8 = vmul.f32 %v2993_v13, %v3587_v5  ;;  %v3598_v25 = vmul.f32 %v2996_v14, %v3587_v5  ;;  %v3602_v53 = vmul.f32 %v3000_v16, %v3587_v5  ;;  %v1762_v49 = vadd.f32 %v1708_v43, %v1641_v1 }
  0xfc   : > { %v641_v22 = vadd.f32 %v2956_v50, %v640_v6  ;;  %v1763_v30 = vadd.f32 %v1710_v31, %v1642_v42  ;;  %vm772_vm11 = vcmp.ge.s32.totalorder %v758_v58, 1  ;;  %vm782_vm12 = vcmp.lt.s32.totalorder %v758_v58, 17 }
  0xfd   : > { %4475 = vst [vmem:[#allocation39_spill] sm:$0xff] %v3602_v53  ;;  %v1782_v59 = vadd.f32 %v3592_v0, %v1762_v49  ;;  %v1006_v42 = vmul.f32 %v2996_v14, %v3240_v21  ;;  %vm3620_vm13 = vmand %vm772_vm11, %vm782_vm12  ;;  %v1128_v6 = vmul.f32 %v3000_v16, %v3240_v21  ;;  %v4478_v31 = vmov %v4473_v45 }
  0xfe   : > { %v699_v44 = vmax.f32 %v641_v22, 0.0  ;;  %v1783_v11 = vadd.f32 %v3592_v0, %v1763_v30  ;;  %vm823_vm2 = vmand %vm3620_vm13, %vm793_vm8  ;;  %v4481_v30 = vrot.slane %v3402_v38, 2  ;;  %v1232_v1 = vmul.f32 %v3048_v57, %v3394_v37 }
  0xff   : > { %v1798_v7 = vmax.f32 %v1782_v59, 0.0  ;;  %v1069_v22 = vrot.slane %v1006_v42, 1  ;;  %v4479_v59 = vrot.slane %v3398_v41, 1  ;;  %v946_v45 = vsel %vm823_vm2, %v745_v33, 0.0  ;;  %vm858_vm9 = vmand %vm3620_vm13, %vm828_vm0 }
 0x100   : > { %v729_v40 = vmin.f32 %v699_v44, 6.0  ;;  %v1799_v43 = vmax.f32 %v1783_v11, 0.0  ;;  %v1468_v58 = vsel %vm1155_vm15, %v4481_v30, %v4480_v3  ;;  %v1191_v34 = vrot.slane %v1128_v6, 2 }
 0x101   : > { %v1347_v49 = vsel %vm1033_vm14, %v4479_v59, %v4478_v31  ;;  %v1814_v11 = vmin.f32 %v1798_v7, 6.0  ;;  %v4483_v7 = vrot.slane %v3271_v48, 1  ;;  %v1192_v59 = vrot.slane %v1129_v4, 2 }
 0x102   : > { %v3642_v44 = vsel %vm840_vm10, %v729_v40, 0.0  ;;  %v1815_v33 = vmin.f32 %v1799_v43, 6.0  ;;  %v4484_v43 = vrot.slane %v3598_v25, 1  ;;  %v4485_v4 = vrot.slane %v3602_v53, 2 }
 0x103   : > { %4482 = vst [vmem:[#allocation40_spill] sm:$0xff] %v3642_v44  ;;  %v996_v42 = vmul.f32 %v2996_v14, %v3642_v44  ;;  %v1118_v36 = vmul.f32 %v3000_v16, %v3642_v44  ;;  %v3650_v41 = vmul.f32 %v3003_v17, %v3642_v44  ;;  %v3654_v38 = vmul.f32 %v3006_v18, %v3642_v44  ;;  %v643_v31 = vpop.f32.mrf.mxu0 }
 0x104   : > { %v3658_v40 = vmul.f32 %v3009_v19, %v3642_v44  ;;  %v1071_v6 = vsel %vm1033_vm14, %v1069_v22, %v4483_v7  ;;  %v1830_v2 = vpack.c.bf16 %v1815_v33, %v1814_v11  ;;  %v1193_v0 = vsel %vm1155_vm15, %v1191_v34, %v1192_v59  ;;  %v683_v44 = vpop.f32.mrf.mxu3 }
 0x105   : > { %v1052_v3 = vrot.slane %v996_v42, 1  ;;  %v1174_v30 = vrot.slane %v1118_v36, 2  ;;  %v1104_v56 = vadd.f32 %v1071_v6, %v966_v28  ;;  %v1518_v42 = vmul.f32 %v3455_v54, %v946_v45 }
 0x106   : > { %v1558_v36 = vmul.f32 %v3009_v19, %v946_v45  ;;  %1914 = vmatmul.bf16.vlgmr.msra.gmra.mxu1 %v1830_v2  ;;  %v3680_v34 = vmul.f32 %v3549_v24, %v946_v45  ;;  %v644_v33 = vadd.f32 %v2956_v50, %v643_v31  ;;  %v753_v6 = vadd.s32 4, %v2959_v51  ;;  %v463_v45 = vld [vmem:[%s2899_s20 + $0x4c] sm:$0xf] }
 0x107   : > { %v1053_v48 = vsel %vm1033_vm14, %v4484_v43, %v1052_v3  ;;  %v3673_v22 = vsel %vm1155_vm15, %v4485_v4, %v1174_v30  ;;  %v1226_v28 = vadd.f32 %v1193_v0, %v1104_v56  ;;  %v684_v3 = vadd.f32 %v2956_v50, %v683_v44  ;;  %v462_v43 = vld [vmem:[%s2899_s20 + $0x48] sm:$0xf] }
 0x108   : > { %v3677_v11 = vadd.f32 %v1053_v48, %v959_v8  ;;  %v1620_v7 = vrot.slane %v1558_v36, 1  ;;  %v967_v30 = vmul.f32 %v2993_v13, %v3265_v29  ;;  %v700_v2 = vmax.f32 %v644_v33, 0.0  ;;  %v3735_v8 = vld [vmem:[%s4351_s3] ss:$0 sm:$0xff] }
 0x109   : > { %v1259_v4 = vadd.f32 %v3421_v61, %v1226_v28  ;;  %v4486_v56 = vrot.slane %v3322_v47, 2  ;;  %vm767_vm3 = vcmp.ge.s32.totalorder %v753_v6, 1  ;;  %vm777_vm5 = vcmp.lt.s32.totalorder %v753_v6, 17 }
 0x10a   : > { %v716_v31 = vmax.f32 %v684_v3, 0.0  ;;  %v1105_v48 = vadd.f32 %v3383_v62, %v967_v30  ;;  %v730_v36 = vmin.f32 %v700_v2, 6.0  ;;  %vm3695_vm6 = vmand %vm767_vm3, %vm777_vm5  ;;  %v4489_v61 = vrot.slane %v3556_v10, 2 }
 0x10b   : > { %v1195_v0 = vsel %vm1155_vm15, %v1192_v59, %v4486_v56  ;;  %v645_v50 = vpop.f32.mrf.mxu0  ;;  %v1380_v44 = vadd.f32 %v1347_v49, %v1259_v4  ;;  %v4490_v28 = vrot.slane %v3506_v9, 2  ;;  %v2079_v59 = vshrl.u32 %v462_v43, 16  ;;  %vm808_vm7 = vmand %vm3695_vm6, %vm793_vm8 }
 0x10c   : > { %v746_v62 = vmin.f32 %v716_v31, 6.0  ;;  %v1227_v49 = vadd.f32 %v1195_v0, %v1105_v48  ;;  %v2082_v33 = vshll.u32 %v462_v43, 16  ;;  %v2088_v6 = vshll.u32 %v463_v45, 16  ;;  %v464_v43 = vld [vmem:[%s2899_s20 + $0x50] sm:$0xf]  ;;  %vm843_vm10 = vmand %vm3695_vm6, %vm828_vm0 }
 0x10d   : > { %v1470_v47 = vsel %vm1155_vm15, %v4490_v28, %v4489_v61  ;;  %v1501_v3 = vadd.f32 %v1468_v58, %v1380_v44  ;;  %v3708_v30 = vsel %vm808_vm7, %v730_v36, 0.0  ;;  %v2081_v4 = vrot.slane %v2079_v59, 4  ;;  %v685_v44 = vpop.f32.mrf.mxu3 }
 0x10e   : > { %v2092_v10 = vshrl.u32 %v463_v45, 16  ;;  %v3712_v9 = vmul.f32 %v2996_v14, %v3708_v30  ;;  %v3716_v2 = vmul.f32 %v3000_v16, %v3708_v30  ;;  %v947_v56 = vsel %vm3620_vm13, %v746_v62, 0.0 }
 0x10f   : > { %v1260_v0 = vadd.f32 %v3502_v46, %v1227_v49  ;;  %v3722_v31 = vadd.f32 %v1518_v42, %v1501_v3  ;;  %v1519_v58 = vmul.f32 %v3455_v54, %v947_v56  ;;  %v1559_v45 = vmul.f32 %v3009_v19, %v947_v56 }
 0x110   : > { %4491 = vst [vmem:[#allocation41_spill] sm:$0xff] %v3712_v9  ;;  %v3727_v48 = vmul.f32 %v3549_v24, %v947_v56  ;;  %v2084_v28 = vrot.slane %v2082_v33, 5  ;;  %v2090_v59 = vrot.slane %v2088_v6, 5  ;;  %v2094_v49 = vrot.slane %v2092_v10, 4 }
 0x111   : > { %4492 = vst [vmem:[#allocation42_spill] sm:$0xff] %v3716_v2  ;;  %v1381_v61 = vadd.f32 %v3578_v15, %v1260_v0  ;;  %v1621_v62 = vrot.slane %v1559_v45, 1  ;;  %v2098_v42 = vshll.u32 %v464_v43, 16  ;;  %v646_v56 = vadd.f32 %v3735_v8, %v645_v50 }
 0x112   : > { %v4397_v46 = vrot.slane %v3727_v48, 2  ;;  %v2085_v21 = vor.u32 %v2084_v28, %v2081_v4  ;;  %v686_v36 = vadd.f32 %v3735_v8, %v685_v44  ;;  %v2095_v33 = vor.u32 %v2094_v49, %v2090_v59 }
 0x113   : > { %v1502_v3 = vadd.f32 %v1470_v47, %v1381_v61  ;;  %v648_v63 = vpop.f32.mrf.mxu0  ;;  %v3740_v15 = vsel %vm1033_vm14, %v1620_v7, %v1621_v62  ;;  %v2100_v6 = vrot.slane %v2098_v42, 5  ;;  %v701_v4 = vmax.f32 %v646_v56, 0.0 }
 0x114   : > { %v649_v10 = vadd.f32 %v3735_v8, %v648_v63  ;;  %v2086_v47 = vrot.slane %v2085_v21, 4  ;;  %v717_v43 = vmax.f32 %v686_v36, 0.0  ;;  %v2096_v45 = vrot.slane %v2095_v33, 4 }
 0x115   : > { %v1535_v0 = vadd.f32 %v1519_v58, %v1502_v3  ;;  %v1214_v44 = vadd.f32 %v3261_v39, %v3256_v52  ;;  %v1231_v7 = vmul.f32 %v3048_v57, %v3335_v26  ;;  %v731_v58 = vmin.f32 %v701_v4, 6.0 }
 0x116   : > { %v702_v50 = vmax.f32 %v649_v10, 0.0  ;;  %v2091_v63 = vsel %vm2937_vm4, %v2086_v47, %v2090_v59  ;;  %v747_v21 = vmin.f32 %v717_v43, 6.0  ;;  %v2101_v36 = vsel %vm2937_vm4, %v2096_v45, %v2100_v6 }
 0x117   : > { %v2161_v52 = vunpack.c.l.b16 %v2091_v63  ;;  %v1247_v61 = vadd.f32 %v1231_v7, %v1214_v44  ;;  %v2162_v28 = vunpack.c.l.b16 %v2101_v36  ;;  %v3763_v59 = vsel %vm3695_vm6, %v731_v58, 0.0 }
 0x118   : > { %v732_v39 = vmin.f32 %v702_v50, 6.0  ;;  %v948_v49 = vsel %vm858_vm9, %v747_v21, 0.0  ;;  %v1248_v42 = vadd.f32 %v1232_v1, %v3342_v55  ;;  %v961_v6 = vmul.f32 %v2993_v13, %v3763_v59 }
 0x119   : > { %v1560_v3 = vmul.f32 %v3009_v19, %v948_v49  ;;  %v1681_v56 = vmul.f32 %v3549_v24, %v948_v49  ;;  %v2172_v10 = vpack.c.b16 %v2162_v28, %v2161_v52  ;;  %v3774_v47 = vmul.f32 %v2996_v14, %v3763_v59 }
 0x11a   : > { %v3768_v33 = vsel %vm843_vm10, %v732_v39, 0.0  ;;  %v3780_v55 = vmul.f32 %v3000_v16, %v3763_v59  ;;  %v1541_v49 = vmul.f32 %v3009_v19, %v3587_v5  ;;  %v1661_v52 = vmul.f32 %v3549_v24, %v3532_v20 }
 0x11b   : > { %4493 = vst [vmem:[#allocation43_spill] sm:$0xff] %v3774_v47  ;;  %v999_v12 = vmul.f32 %v2996_v14, %v3768_v33  ;;  %v1623_v4 = vrot.slane %v1560_v3, 1  ;;  %v1744_v43 = vrot.slane %v1681_v56, 2  ;;  %v1121_v45 = vmul.f32 %v3000_v16, %v3768_v33  ;;  %2533 = vmatmul.msk.bf16.gmra.mxu2 %vm554_vm1, %v2172_v10 }
 0x11c   : > { %4494 = vst [vmem:[#allocation44_spill] sm:$0xff] %v3780_v55  ;;  %v3786_v50 = vmul.f32 %v3003_v17, %v3768_v33  ;;  %v4396_v44 = vrot.slane %v3774_v47, 1  ;;  %v4395_v63 = vrot.slane %v3780_v55, 2  ;;  %v3793_v58 = vmul.f32 %v3006_v18, %v3768_v33 }
 0x11d   : > { %v1057_v7 = vrot.slane %v999_v12, 1  ;;  %v1624_v21 = vsel %vm1033_vm14, %v1621_v62, %v1623_v4  ;;  %v3799_v1 = vsel %vm1155_vm15, %v4397_v46, %v1744_v43  ;;  %v1179_v36 = vrot.slane %v1121_v45, 2  ;;  %v650_v12 = vpop.f32.mrf.mxu0 }
 0x11e   : > { %4495 = vst [vmem:[#allocation45_spill] sm:$0xff] %v3786_v50  ;;  %v3802_v39 = vadd.f32 %v1624_v21, %v1535_v0  ;;  %v3810_v3 = vmul.f32 %v3009_v19, %v3768_v33  ;;  %v1265_v0 = vmul.f32 %v3003_v17, %v3335_v26  ;;  %v1266_v10 = vmul.f32 %v3003_v17, %v3394_v37 }
 0x11f   : > { %4496 = vst [vmem:[#allocation46_spill] sm:$0xff] %v3793_v58  ;;  %v1058_v28 = vsel %vm1033_vm14, %v4396_v44, %v1057_v7  ;;  %v3817_v56 = vsel %vm1155_vm15, %v4395_v63, %v1179_v36  ;;  %v1386_v43 = vmul.f32 %v3006_v18, %v3335_v26  ;;  %v1506_v45 = vmul.f32 %v3455_v54, %v3532_v20  ;;  %v467_v58 = vld [vmem:[%s2899_s20 + $0x5c] sm:$0xf] }
 0x120   : > { %v3812_v62 = vadd.f32 %v1058_v28, %v961_v6  ;;  %4498 = vst [vmem:[#allocation48_spill] sm:$0xff] %v3817_v56  ;;  %v1387_v6 = vmul.f32 %v3006_v18, %v3394_v37  ;;  %v1315_v7 = vrot.slane %v1265_v0, 1  ;;  %v1316_v21 = vrot.slane %v1266_v10, 1 }
 0x121   : > { %v1507_v36 = vmul.f32 %v3455_v54, %v3587_v5  ;;  %v1540_v28 = vmul.f32 %v3009_v19, %v3532_v20  ;;  %v1436_v63 = vrot.slane %v1386_v43, 2  ;;  %v4499_v0 = vrot.slane %v3471_v35, 1  ;;  %v465_v43 = vld [vmem:[%s2899_s20 + $0x54] sm:$0xf] }
 0x122   : > { %4497 = vst [vmem:[#allocation47_spill] sm:$0xff] %v3812_v62  ;;  %v1437_v44 = vrot.slane %v1387_v6, 2  ;;  %v1317_v37 = vsel %vm1033_vm14, %v1315_v7, %v1316_v21  ;;  %v1662_v46 = vmul.f32 %v3549_v24, %v3587_v5  ;;  %v4500_v56 = vrot.slane %v3476_v27, 2  ;;  %v4501_v7 = vld [vmem:[#allocation40_spill] sm:$0xff] }
 0x123   : > { %v1319_v10 = vsel %vm1033_vm14, %v1316_v21, %v4499_v0  ;;  %v1590_v4 = vrot.slane %v1540_v28, 1  ;;  %v1368_v6 = vadd.f32 %v1317_v37, %v1247_v61  ;;  %v1591_v2 = vrot.slane %v1541_v49, 1  ;;  %v466_v0 = vld [vmem:[%s2899_s20 + $0x58] sm:$0xf]  ;;  %s2538_s20 = sshll.u32 %s2748_s13, 5  ;;  %s2284_s13 = scalar_lea.sflag [#allocation3], %s4575_s12 }
 0x124   : > { %v1369_v29 = vadd.f32 %v1319_v10, %v1248_v42  ;;  %v1438_v55 = vsel %vm1155_vm15, %v1436_v63, %v1437_v44  ;;  %v1440_v62 = vsel %vm1155_vm15, %v1437_v44, %v4500_v56  ;;  %v1663_v35 = vmul.f32 %v3549_v24, %v4501_v7 }
 0x125   : > { %v1711_v9 = vrot.slane %v1661_v52, 2  ;;  %v1712_v47 = vrot.slane %v1662_v46, 2  ;;  %v1489_v21 = vadd.f32 %v1438_v55, %v1368_v6  ;;  %v2103_v50 = vshrl.u32 %v465_v43, 16  ;;  %v653_v10 = vpop.f32.mrf.mxu0 }
 0x126   : > { %v1490_v28 = vadd.f32 %v1440_v62, %v1369_v29  ;;  %v2106_v53 = vshll.u32 %v465_v43, 16  ;;  %v1592_v61 = vsel %vm1033_vm14, %v1590_v4, %v1591_v2  ;;  %v4502_v42 = vrot.slane %v3658_v40, 1 }
 0x127   : > { %v1713_v44 = vsel %vm1155_vm15, %v1711_v9, %v1712_v47  ;;  %v1714_v63 = vrot.slane %v1663_v35, 2  ;;  %v1522_v49 = vadd.f32 %v1506_v45, %v1489_v21  ;;  %v2105_v37 = vrot.slane %v2103_v50, 4 }
 0x128   : > { %v1594_v27 = vsel %vm1033_vm14, %v1591_v2, %v4502_v42  ;;  %v1523_v56 = vadd.f32 %v1507_v36, %v1490_v28  ;;  %v2108_v52 = vrot.slane %v2106_v53, 5  ;;  %v2112_v29 = vshll.u32 %v466_v0, 16 }
 0x129   : > { %v1715_v46 = vsel %vm1155_vm15, %v1712_v47, %v1714_v63  ;;  %v2116_v55 = vshrl.u32 %v466_v0, 16  ;;  %v2122_v62 = vshll.u32 %v467_v58, 16  ;;  %v1643_v43 = vadd.f32 %v1592_v61, %v1522_v49  ;;  %v4503_v58 = vld [vmem:[#allocation38_spill] sm:$0xff] }
 0x12a   : > { %v1644_v6 = vadd.f32 %v1594_v27, %v1523_v56  ;;  %v2109_v4 = vor.u32 %v2108_v52, %v2105_v37  ;;  %v651_v40 = vadd.f32 %v3735_v8, %v650_v12  ;;  %v2114_v7 = vrot.slane %v2112_v29, 5 }
 0x12b   : > { %v2118_v2 = vrot.slane %v2116_v55, 4  ;;  %v2124_v42 = vrot.slane %v2122_v62, 5  ;;  %v754_v9 = vadd.s32 5, %v2959_v51  ;;  %v1764_v45 = vadd.f32 %v1713_v44, %v1643_v43 }
 0x12c   : > { %v1765_v36 = vadd.f32 %v1715_v46, %v1644_v6  ;;  %v2110_v50 = vrot.slane %v2109_v4, 4  ;;  %v703_v53 = vmax.f32 %v651_v40, 0.0  ;;  %v654_v47 = vadd.f32 %v3735_v8, %v653_v10 }
 0x12d   : > { %v2119_v35 = vor.u32 %v2118_v2, %v2114_v7  ;;  %vm768_vm11 = vcmp.ge.s32.totalorder %v754_v9, 1  ;;  %vm778_vm12 = vcmp.lt.s32.totalorder %v754_v9, 17  ;;  %v1784_v21 = vadd.f32 %v4503_v58, %v1764_v45  ;;  %v470_v2 = vld [vmem:[%s2917_s29 + $0x8] sm:$0xf]  ;;  %v655_v9 = vpop.f32.mrf.mxu0 }
 0x12e   : > { %v1785_v28 = vadd.f32 %v4503_v58, %v1765_v36  ;;  %v2115_v12 = vsel %vm2937_vm4, %v2110_v50, %v2114_v7  ;;  %v733_v0 = vmin.f32 %v703_v53, 6.0  ;;  %vm3866_vm13 = vmand %vm768_vm11, %vm778_vm12  ;;  %v704_v44 = vmax.f32 %v654_v47, 0.0 }
 0x12f   : > { %v2120_v61 = vrot.slane %v2119_v35, 4  ;;  %v2163_v27 = vunpack.c.l.b16 %v2115_v12  ;;  %vm811_vm2 = vmand %vm3866_vm13, %vm793_vm8  ;;  %v1655_v63 = vadd.f32 %v3740_v15, %v3722_v31  ;;  %v1800_v49 = vmax.f32 %v1784_v21, 0.0 }
 0x130   : > { %v1801_v56 = vmax.f32 %v1785_v28, 0.0  ;;  %v3876_v37 = vsel %vm811_vm2, %v733_v0, 0.0  ;;  %v4506_v52 = vrot.slane %v3727_v48, 2  ;;  %v4507_v46 = vrot.slane %v3680_v34, 2  ;;  %v469_v34 = vld [vmem:[%s2917_s29 + $0x4] sm:$0xf]  ;;  %vm846_vm8 = vmand %vm3866_vm13, %vm828_vm0  ;;  %s2295_s29 = sadd.s32 %s2538_s20, %s2537_s21 }
 0x131   : > { %v2125_v55 = vsel %vm2937_vm4, %v2120_v61, %v2124_v42  ;;  %v3888_v62 = vmul.f32 %v2996_v14, %v3876_v37  ;;  %v3892_v31 = vmul.f32 %v3000_v16, %v3876_v37  ;;  %v734_v15 = vmin.f32 %v704_v44, 6.0  ;;  %s2539_s17 = sshll.u32 %s2295_s29, 3 }
 0x132   : > { %v1743_v29 = vsel %vm1155_vm15, %v4507_v46, %v4506_v52  ;;  %v1816_v10 = vmin.f32 %v1800_v49, 6.0  ;;  %v1817_v43 = vmin.f32 %v1801_v56, 6.0  ;;  %v2164_v48 = vunpack.c.l.b16 %v2125_v55  ;;  %s2297_s24 = scalar_lea.hbm %s4357_s9, %s2539_s17 }
 0x133   : > { %v1776_v6 = vadd.f32 %v1743_v29, %v1655_v63  ;;  %v1059_v4 = vrot.slane %v3888_v62, 1  ;;  %v3898_v40 = vsel %vm3866_vm13, %v734_v15, 0.0  ;;  %v1777_v7 = vadd.f32 %v3799_v1, %v3802_v39  ;;  %s2300_s26 = sshll.u32 %s2297_s24, 4  ;;  %s2301_s26 = int_to_ptr.hbm [resolvable:$true] %s2300_s26 }
 0x134   : > { %v2127_v42 = vshrl.u32 %v468_v60, 16  ;;  %v1831_v45 = vpack.c.bf16 %v1817_v43, %v1816_v10  ;;  %v2173_v36 = vpack.c.b16 %v2164_v48, %v2163_v27  ;;  %v2130_v53 = vshll.u32 %v468_v60, 16  ;;  %v4508_v48 = vld [vmem:[#allocation27_spill] sm:$0xff]  ;;  %s2680_s21 = sshra.s32 %s2301_s26, 4  ;;  %s2681_s21 = int_to_ptr.hbm [resolvable:$true] %s2680_s21 }
 0x135   : > { %v1796_v50 = vadd.f32 %v4503_v58, %v1776_v6  ;;  %v1797_v35 = vadd.f32 %v4503_v58, %v1777_v7  ;;  %v2136_v21 = vshll.u32 %v469_v34, 16  ;;  %v2140_v28 = vshrl.u32 %v469_v34, 16  ;;  %v4510_v34 = vld [vmem:[#allocation24_spill] sm:$0xff]  ;;  %s2682_s20 = scalar_lea.hbm %s2681_s21, 128  ;;  %p2687_p5 = scmp.lt.s32.totalorder %s2681_s21, %s4357_s9 }
 0x136   : > { %v2129_v47 = vrot.slane %v2127_v42, 4  ;;  %1919 = vmatmul.bf16.gmra.mxu1 %v1831_v45  ;;  %2534 = vmatmul.msk.bf16.gmra.mxu2 %vm554_vm1, %v2173_v36  ;;  %v2132_v0 = vrot.slane %v2130_v53, 5  ;;  %v2146_v61 = vshll.u32 %v470_v2, 16  ;;  %v656_v1 = vadd.f32 %v3735_v8, %v655_v9  ;;  %v4512_v53 = vld [vmem:[#allocation25_spill] sm:$0xff]  ;;  %p2683_p1 = scmp.ne.s32.totalorder %s2681_s21, %s2682_s20  ;;  %p2688_p6 = scmp.lt.s32.totalorder %s2686_s25, %s2682_s20 }
 0x137   : > { %v1812_v12 = vmax.f32 %v1796_v50, 0.0  ;;  %v1813_v39 = vmax.f32 %v1797_v35, 0.0  ;;  %v2138_v44 = vrot.slane %v2136_v21, 5  ;;  %v2142_v63 = vrot.slane %v2140_v28, 4 }
 0x138   : > { %v963_v27 = vmul.f32 %v2993_v13, %v3898_v40  ;;  %v2133_v56 = vor.u32 %v2132_v0, %v2129_v47  ;;  %v2148_v52 = vrot.slane %v2146_v61, 5  ;;  %v705_v46 = vmax.f32 %v656_v1, 0.0  ;;  %p2684_p2 = pnand %p2683_p1, %p2865_p3  ;;  %p2689_p7 = por %p2688_p6, %p2687_p5 }
 0x139   : > { %v1828_v49 = vmin.f32 %v1812_v12, 6.0  ;;  %v1829_v29 = vmin.f32 %v1813_v39, 6.0  ;;  %v2143_v60 = vor.u32 %v2142_v63, %v2138_v44  ;;  %v3915_v8 = vmul.f32 %v2996_v14, %v3898_v40 }
 0x13a   : > { %v3919_v55 = vmul.f32 %v3000_v16, %v3898_v40  ;;  %v2134_v15 = vrot.slane %v2133_v56, 4  ;;  %v735_v10 = vmin.f32 %v705_v46, 6.0  ;;  %v956_v43 = vmul.f32 %v2993_v13, %v3335_v26  ;;  %p2685_p4 = pneg %p2684_p2 }
 0x13b   : > { %v4509_v6 = vrot.slane %v4508_v48, 1  ;;  %v4511_v23 = vrot.slane %v4510_v34, 1  ;;  %v1837_v7 = vpack.c.bf16 %v1829_v29, %v1828_v49  ;;  %v2144_v2 = vrot.slane %v2143_v60, 4  ;;  %v4516_v49 = vld [vmem:[#allocation31_spill] sm:$0xff] }
 0x13c   : > { %v1060_v42 = vrot.slane %v3915_v8, 1  ;;  %v1182_v9 = vrot.slane %v3919_v55, 2  ;;  %v2139_v45 = vsel %vm2937_vm4, %v2134_v15, %v2138_v44  ;;  %v3932_v36 = vsel %vm846_vm8, %v735_v10, 0.0  ;;  %v4513_v44 = vld [vmem:[#allocation28_spill] sm:$0xff]  ;;  %p2690_p9 = pnand %p2689_p7, %p2685_p4 }
 0x13d   : > { %v1046_v51 = vsel %vm1033_vm14, %v4511_v23, %v4509_v6  ;;  %v1166_v26 = vrot.slane %v4512_v53, 2  ;;  %1949 = vmatmul.bf16.vlgmr.msrb.gmra.mxu3 %v1837_v7  ;;  %v2149_v35 = vsel %vm2937_vm4, %v2144_v2, %v2148_v52  ;;  %v2165_v47 = vunpack.c.l.b16 %v2139_v45  ;;  %v3971_v6 = vpop.f32.mrf.mxu2 }
 0x13e   : > { %v1094_v50 = vadd.f32 %v1046_v51, %v956_v43  ;;  %v1002_v21 = vmul.f32 %v2996_v14, %v3932_v36  ;;  %v1124_v28 = vmul.f32 %v3000_v16, %v3932_v36  ;;  %v2166_v12 = vunpack.c.l.b16 %v2149_v35  ;;  %v4515_v16 = vld [vmem:[#allocation33_spill] sm:$0xff] }
 0x13f   : > { %v3943_v0 = vmul.f32 %v3003_v17, %v3932_v36  ;;  %v3947_v61 = vmul.f32 %v3006_v18, %v3932_v36  ;;  %v3951_v32 = vmul.f32 %v3009_v19, %v3932_v36  ;;  %v4514_v14 = vrot.slane %v4513_v44, 2 }
 0x140   : > { %v1062_v1 = vrot.slane %v1002_v21, 1  ;;  %v1184_v39 = vrot.slane %v1124_v28, 2  ;;  %v1217_v56 = vadd.f32 %v4516_v49, %v4515_v16  ;;  %v2174_v52 = vpack.c.b16 %v2166_v12, %v2165_v47 }
 0x141   : > { %v1168_v63 = vsel %vm1155_vm15, %v1166_v26, %v4514_v14  ;;  %v1333_v46 = vrot.slane %v3943_v0, 1  ;;  %v1454_v29 = vrot.slane %v3947_v61, 2  ;;  %v1603_v60 = vrot.slane %v3951_v32, 1 }
 0x142   : > { %v1063_v15 = vsel %vm1033_vm14, %v1060_v42, %v1062_v1  ;;  %v3967_v10 = vsel %vm1155_vm15, %v1182_v9, %v1184_v39  ;;  %v1216_v43 = vadd.f32 %v1168_v63, %v1094_v50  ;;  %v1233_v48 = vmul.f32 %v3048_v57, %v3532_v20 }
 0x143   : > { %v3973_v34 = vadd.f32 %v1063_v15, %v963_v27  ;;  %v1234_v23 = vmul.f32 %v3048_v57, %v3587_v5  ;;  %v1268_v51 = vmul.f32 %v3003_v17, %v3532_v20  ;;  %v1269_v7 = vmul.f32 %v3003_v17, %v3587_v5 }
 0x144   : > { %v1249_v2 = vadd.f32 %v1233_v48, %v1216_v43  ;;  %v1389_v45 = vmul.f32 %v3006_v18, %v3532_v20  ;;  %v1390_v50 = vmul.f32 %v3006_v18, %v3587_v5  ;;  %v1508_v27 = vmul.f32 %v3455_v54, %v3708_v30 }
 0x145   : > { %v1250_v53 = vadd.f32 %v1234_v23, %v1217_v56  ;;  %v1320_v26 = vrot.slane %v1268_v51, 1  ;;  %v1321_v35 = vrot.slane %v1269_v7, 1  ;;  %v1509_v47 = vmul.f32 %v3455_v54, %v3763_v59 }
 0x146   : > { %v1441_v21 = vrot.slane %v1389_v45, 2  ;;  %v1442_v28 = vrot.slane %v1390_v50, 2  ;;  %v1543_v12 = vmul.f32 %v3009_v19, %v3708_v30  ;;  %v1544_v1 = vmul.f32 %v3009_v19, %v3763_v59  ;;  %2535 = vmatmul.msk.bf16.gmra.mxu2 %vm554_vm1, %v2174_v52 }
 0x147   : > { %v1322_v5 = vsel %vm1033_vm14, %v1320_v26, %v1321_v35  ;;  %v4517_v39 = vrot.slane %v3650_v41, 1  ;;  %v1664_v14 = vmul.f32 %v3549_v24, %v3708_v30  ;;  %v1665_v63 = vmul.f32 %v3549_v24, %v3763_v59 }
 0x148   : > { %v1370_v16 = vadd.f32 %v1322_v5, %v1249_v2  ;;  %v1443_v56 = vsel %vm1155_vm15, %v1441_v21, %v1442_v28  ;;  %v4518_v15 = vrot.slane %v3654_v38, 2  ;;  %v1595_v43 = vrot.slane %v1543_v12, 1  ;;  %v4521_v21 = vld [vmem:[#allocation34_spill] sm:$0xff] }
 0x149   : > { %v1324_v44 = vsel %vm1033_vm14, %v1321_v35, %v4517_v39  ;;  %v1596_v48 = vrot.slane %v1544_v1, 1  ;;  %v1666_v41 = vmul.f32 %v3549_v24, %v3768_v33  ;;  %v1716_v23 = vrot.slane %v1664_v14, 2  ;;  %v4523_v14 = vld [vmem:[#allocation36_spill] sm:$0xff] }
 0x14a   : > { %v1371_v49 = vadd.f32 %v1324_v44, %v1250_v53  ;;  %v1445_v52 = vsel %vm1155_vm15, %v1442_v28, %v4518_v15  ;;  %v1491_v51 = vadd.f32 %v1443_v56, %v1370_v16  ;;  %v1717_v45 = vrot.slane %v1665_v63, 2  ;;  %v4020_v44 = vpop.f32.mrf.mxu2  ;;  %v4524_v56 = vld [vmem:[#allocation39_spill] sm:$0xff] }
 0x14b   : > { %v958_v50 = vmul.f32 %v2993_v13, %v3532_v20  ;;  %v1597_v2 = vsel %vm1033_vm14, %v1595_v43, %v1596_v48  ;;  %v4519_v53 = vrot.slane %v3810_v3, 1  ;;  %v1719_v26 = vrot.slane %v1666_v41, 2 }
 0x14c   : > { %v1492_v7 = vadd.f32 %v1445_v52, %v1371_v49  ;;  %v4520_v35 = vrot.slane %v3598_v25, 1  ;;  %v4522_v28 = vrot.slane %v4521_v21, 1  ;;  %v1524_v12 = vadd.f32 %v1508_v27, %v1491_v51 }
 0x14d   : > { %v1599_v38 = vsel %vm1033_vm14, %v1596_v48, %v4519_v53  ;;  %v1718_v5 = vsel %vm1155_vm15, %v1716_v23, %v1717_v45  ;;  %v1720_v20 = vsel %vm1155_vm15, %v1717_v45, %v1719_v26  ;;  %v1171_v3 = vrot.slane %v4523_v14, 2 }
 0x14e   : > { %v1051_v33 = vsel %vm1033_vm14, %v4522_v28, %v4520_v35  ;;  %v1525_v1 = vadd.f32 %v1509_v47, %v1492_v7  ;;  %v1219_v63 = vadd.f32 %v3673_v22, %v3677_v11  ;;  %v1235_v25 = vmul.f32 %v3048_v57, %v3708_v30  ;;  %v4526_v28 = vld [vmem:[#allocation45_spill] sm:$0xff] }
 0x14f   : > { %v1096_v39 = vadd.f32 %v1051_v33, %v958_v50  ;;  %v1645_v16 = vadd.f32 %v1597_v2, %v1524_v12  ;;  %v1236_v27 = vmul.f32 %v3048_v57, %v3763_v59  ;;  %v1271_v47 = vmul.f32 %v3003_v17, %v3708_v30 }
 0x150   : > { %v1646_v49 = vadd.f32 %v1599_v38, %v1525_v1  ;;  %v4525_v15 = vrot.slane %v4524_v56, 2  ;;  %v1272_v43 = vmul.f32 %v3003_v17, %v3763_v59  ;;  %v1392_v22 = vmul.f32 %v3006_v18, %v3708_v30  ;;  %v4528_v1 = vld [vmem:[#allocation46_spill] sm:$0xff] }
 0x151   : > { %v1393_v11 = vmul.f32 %v3006_v18, %v3763_v59  ;;  %v1766_v48 = vadd.f32 %v1718_v5, %v1645_v16  ;;  %v1252_v51 = vadd.f32 %v1236_v27, %v1219_v63  ;;  %v1325_v7 = vrot.slane %v1271_v47, 1 }
 0x152   : > { %v1173_v52 = vsel %vm1155_vm15, %v1171_v3, %v4525_v15  ;;  %v1767_v41 = vadd.f32 %v1720_v20, %v1646_v49  ;;  %v1326_v45 = vrot.slane %v1272_v43, 1  ;;  %v1446_v50 = vrot.slane %v1392_v22, 2  ;;  %v4061_v43 = vpop.f32.mrf.mxu2 }
 0x153   : > { %v1218_v23 = vadd.f32 %v1173_v52, %v1096_v39  ;;  %v1447_v2 = vrot.slane %v1393_v11, 2  ;;  %v1786_v53 = vadd.f32 %v4503_v58, %v1766_v48  ;;  %v1510_v35 = vmul.f32 %v3455_v54, %v3876_v37 }
 0x154   : > { %v1787_v38 = vadd.f32 %v4503_v58, %v1767_v41  ;;  %v1327_v21 = vsel %vm1033_vm14, %v1325_v7, %v1326_v45  ;;  %v4527_v59 = vrot.slane %v4526_v28, 1  ;;  %v4529_v5 = vrot.slane %v4528_v1, 2 }
 0x155   : > { %v1251_v26 = vadd.f32 %v1235_v25, %v1218_v23  ;;  %v1448_v12 = vsel %vm1155_vm15, %v1446_v50, %v1447_v2  ;;  %v1802_v20 = vmax.f32 %v1786_v53, 0.0  ;;  %v1511_v25 = vmul.f32 %v3455_v54, %v3898_v40 }
 0x156   : > { %v1329_v33 = vsel %vm1033_vm14, %v1326_v45, %v4527_v59  ;;  %v1450_v39 = vsel %vm1155_vm15, %v1447_v2, %v4529_v5  ;;  %v1803_v14 = vmax.f32 %v1787_v38, 0.0  ;;  %v1546_v16 = vmul.f32 %v3009_v19, %v3876_v37  ;;  %v4530_v59 = vld [vmem:[#allocation43_spill] sm:$0xff]  ;;  %v4534_v5 = vld [vmem:[#allocation42_spill] sm:$0xff] }
 0x157   : > { %v1372_v3 = vadd.f32 %v1327_v21, %v1251_v26  ;;  %v1373_v63 = vadd.f32 %v1329_v33, %v1252_v51  ;;  %v1547_v49 = vmul.f32 %v3009_v19, %v3898_v40  ;;  %v1667_v27 = vmul.f32 %v3549_v24, %v3876_v37  ;;  %v4532_v33 = vld [vmem:[#allocation41_spill] sm:$0xff] }
 0x158   : > { %v1818_v47 = vmin.f32 %v1802_v20, 6.0  ;;  %v1819_v56 = vmin.f32 %v1803_v14, 6.0  ;;  %v1600_v22 = vrot.slane %v1546_v16, 1  ;;  %v1668_v48 = vmul.f32 %v3549_v24, %v3898_v40  ;;  %v4536_v20 = vld [vmem:[#allocation48_spill] sm:$0xff] }
 0x159   : > { %v1493_v15 = vadd.f32 %v1448_v12, %v1372_v3  ;;  %v1494_v52 = vadd.f32 %v1450_v39, %v1373_v63  ;;  %v1601_v11 = vrot.slane %v1547_v49, 1  ;;  %v1669_v41 = vmul.f32 %v3549_v24, %v3932_v36  ;;  %v4535_v39 = vld [vmem:[#allocation47_spill] sm:$0xff]  ;;  %v4537_v16 = vld [vmem:[#allocation44_spill] sm:$0xff] }
 0x15a   : > { %v1832_v23 = vpack.c.bf16 %v1819_v56, %v1818_v47  ;;  %v1721_v45 = vrot.slane %v1667_v27, 2  ;;  %v1722_v53 = vrot.slane %v1668_v48, 2  ;;  %v960_v28 = vmul.f32 %v2993_v13, %v3708_v30 }
 0x15b   : > { %v1526_v51 = vadd.f32 %v1510_v35, %v1493_v15  ;;  %v1527_v7 = vadd.f32 %v1511_v25, %v1494_v52  ;;  %v1602_v50 = vsel %vm1033_vm14, %v1600_v22, %v1601_v11  ;;  %v1604_v2 = vsel %vm1033_vm14, %v1601_v11, %v1603_v60 }
 0x15c   : > { %v1724_v38 = vrot.slane %v1669_v41, 2  ;;  %1924 = vmatmul.bf16.gmra.mxu1 %v1832_v23  ;;  %v4531_v36 = vrot.slane %v4530_v59, 1  ;;  %v4533_v35 = vrot.slane %v4532_v33, 1  ;;  %v1723_v1 = vsel %vm1155_vm15, %v1721_v45, %v1722_v53  ;;  %v4539_v59 = vld [vmem:[#allocation6_spill] sm:$0xff] }
 0x15d   : > { %v1647_v26 = vadd.f32 %v1602_v50, %v1526_v51  ;;  %v1648_v21 = vadd.f32 %v1604_v2, %v1527_v7  ;;  %v1176_v60 = vrot.slane %v4534_v5, 2  ;;  %v1221_v14 = vadd.f32 %v4536_v20, %v4535_v39  ;;  %v4540_v5 = vld [vmem:[#allocation9_spill] sm:$0xff] }
 0x15e   : > { %v1056_v12 = vsel %vm1033_vm14, %v4533_v35, %v4531_v36  ;;  %v1725_v32 = vsel %vm1155_vm15, %v1722_v53, %v1724_v38  ;;  %v1237_v30 = vmul.f32 %v3048_v57, %v3876_v37  ;;  %v4538_v49 = vrot.slane %v4537_v16, 2  ;;  %v4100_v38 = vpop.f32.mrf.mxu2 }
 0x15f   : > { %v1768_v3 = vadd.f32 %v1723_v1, %v1647_v26  ;;  %v1769_v63 = vadd.f32 %v1725_v32, %v1648_v21  ;;  %v1098_v25 = vadd.f32 %v1056_v12, %v960_v28  ;;  %v1238_v47 = vmul.f32 %v3048_v57, %v3898_v40 }
 0x160   : > { %v1178_v27 = vsel %vm1155_vm15, %v1176_v60, %v4538_v49  ;;  %v1274_v56 = vmul.f32 %v3003_v17, %v3876_v37  ;;  %v1275_v15 = vmul.f32 %v3003_v17, %v3898_v40  ;;  %v1395_v48 = vmul.f32 %v3006_v18, %v3876_v37 }
 0x161   : > { %v1788_v52 = vadd.f32 %v4503_v58, %v1768_v3  ;;  %v1789_v22 = vadd.f32 %v4503_v58, %v1769_v63  ;;  %v1220_v11 = vadd.f32 %v1178_v27, %v1098_v25  ;;  %v1254_v41 = vadd.f32 %v1238_v47, %v1221_v14 }
 0x162   : > { %v1330_v23 = vrot.slane %v1274_v56, 1  ;;  %v1331_v51 = vrot.slane %v1275_v15, 1  ;;  %v1396_v7 = vmul.f32 %v3006_v18, %v3898_v40  ;;  %v1451_v53 = vrot.slane %v1395_v48, 2 }
 0x163   : > { %v1804_v45 = vmax.f32 %v1788_v52, 0.0  ;;  %v1805_v50 = vmax.f32 %v1789_v22, 0.0  ;;  %v1253_v2 = vadd.f32 %v1237_v30, %v1220_v11  ;;  %v1512_v36 = vmul.f32 %v3455_v54, %v4539_v59  ;;  %v4542_v11 = vld [vmem:[#allocation15_spill] sm:$0xff] }
 0x164   : > { %v1332_v26 = vsel %vm1033_vm14, %v1330_v23, %v1331_v51  ;;  %v1334_v21 = vsel %vm1033_vm14, %v1331_v51, %v1333_v46  ;;  %v1452_v28 = vrot.slane %v1396_v7, 2  ;;  %v1513_v60 = vmul.f32 %v3455_v54, %v4540_v5 }
 0x165   : > { %v1820_v33 = vmin.f32 %v1804_v45, 6.0  ;;  %v1821_v35 = vmin.f32 %v1805_v50, 6.0  ;;  %v1374_v12 = vadd.f32 %v1332_v26, %v1253_v2  ;;  %v1375_v40 = vadd.f32 %v1334_v21, %v1254_v41 }
 0x166   : > { %v1453_v1 = vsel %vm1155_vm15, %v1451_v53, %v1452_v28  ;;  %v1455_v32 = vsel %vm1155_vm15, %v1452_v28, %v1454_v29  ;;  %v1549_v0 = vmul.f32 %v3009_v19, %v4539_v59  ;;  %v1550_v14 = vmul.f32 %v3009_v19, %v4540_v5  ;;  %v4541_v29 = vld [vmem:[#allocation12_spill] sm:$0xff]  ;;  %v4138_v8 = vpop.f32.mrf.mxu2 }
 0x167   : > { %v1833_v46 = vpack.c.bf16 %v1821_v35, %v1820_v33  ;;  %v1495_v39 = vadd.f32 %v1453_v1, %v1374_v12  ;;  %v1496_v20 = vadd.f32 %v1455_v32, %v1375_v40  ;;  %v1670_v63 = vmul.f32 %v3549_v24, %v4539_v59  ;;  %v4544_v1 = vld [vmem:[#allocation18_spill] sm:$0xff] }
 0x168   : > { %v1605_v3 = vrot.slane %v1549_v0, 1  ;;  %v1671_v61 = vmul.f32 %v3549_v24, %v4540_v5  ;;  %v1672_v25 = vmul.f32 %v3549_v24, %v4541_v29  ;;  %v1606_v49 = vrot.slane %v1550_v14, 1  ;;  %v4546_v14 = vld [vmem:[#allocation13_spill] sm:$0xff] }
 0x169   : > { %v1528_v30 = vadd.f32 %v1512_v36, %v1495_v39  ;;  %v1529_v16 = vadd.f32 %v1513_v60, %v1496_v20  ;;  %v962_v27 = vmul.f32 %v2993_v13, %v3876_v37  ;;  %v1726_v47 = vrot.slane %v1670_v63, 2 }
 0x16a   : > { %v1727_v56 = vrot.slane %v1671_v61, 2  ;;  %v1729_v15 = vrot.slane %v1672_v25, 2  ;;  %v1061_v52 = vsel %vm1033_vm14, %v1059_v4, %v1060_v42  ;;  %v1607_v22 = vsel %vm1033_vm14, %v1605_v3, %v1606_v49  ;;  %v4548_v61 = vld [vmem:[#allocation14_spill] sm:$0xff] }
 0x16b   : > { %v4543_v48 = vrot.slane %v4542_v11, 1  ;;  %v1100_v41 = vadd.f32 %v1061_v52, %v962_v27  ;;  %v1181_v23 = vrot.slane %v3892_v31, 2  ;;  %v1649_v51 = vadd.f32 %v1607_v22, %v1528_v30 }
 0x16c   : > { %v1728_v7 = vsel %vm1155_vm15, %v1726_v47, %v1727_v56  ;;  %v1730_v45 = vsel %vm1155_vm15, %v1727_v56, %v1729_v15  ;;  %1929 = vmatmul.bf16.gmra.mxu1 %v1833_v46  ;;  %v1223_v4 = vadd.f32 %v3967_v10, %v3973_v34  ;;  %v1239_v42 = vmul.f32 %v3048_v57, %v4539_v59  ;;  %v4545_v46 = vld [vmem:[#allocation19_spill] sm:$0xff] }
 0x16d   : > { %v1609_v24 = vsel %vm1033_vm14, %v1606_v49, %v4543_v48  ;;  %v1183_v62 = vsel %vm1155_vm15, %v1181_v23, %v1182_v9  ;;  %v1240_v31 = vmul.f32 %v3048_v57, %v4540_v5  ;;  %v1770_v50 = vadd.f32 %v1728_v7, %v1649_v51  ;;  %v4178_v15 = vld [vmem:[%s4352_s4 + $0x8] ss:$0 sm:$0xff] }
 0x16e   : > { %v1650_v37 = vadd.f32 %v1609_v24, %v1529_v16  ;;  %v1222_v53 = vadd.f32 %v1183_v62, %v1100_v41  ;;  %v1277_v26 = vmul.f32 %v3003_v17, %v4539_v59  ;;  %v1278_v55 = vmul.f32 %v3003_v17, %v4540_v5  ;;  %v4550_v41 = vld [vmem:[#allocation20_spill] sm:$0xff]  ;;  %v4186_v7 = vpop.f32.mrf.mxu2 }
 0x16f   : > { %v1256_v21 = vadd.f32 %v1240_v31, %v1223_v4  ;;  %v1398_v9 = vmul.f32 %v3006_v18, %v4539_v59  ;;  %v1399_v10 = vmul.f32 %v3006_v18, %v4540_v5  ;;  %v1790_v34 = vadd.f32 %v4503_v58, %v1770_v50  ;;  %v4551_v31 = vld [vmem:[#allocation10_spill] sm:$0xff] }
 0x170   : > { %v1771_v2 = vadd.f32 %v1730_v45, %v1650_v37  ;;  %v1255_v36 = vadd.f32 %v1239_v42, %v1222_v53  ;;  %v1335_v33 = vrot.slane %v1277_v26, 1  ;;  %v1336_v35 = vrot.slane %v1278_v55, 1  ;;  %v4555_v55 = vld [vmem:[#allocation23_spill] sm:$0xff] }
 0x171   : > { %v1456_v12 = vrot.slane %v1398_v9, 2  ;;  %v1457_v40 = vrot.slane %v1399_v10, 2  ;;  %v1514_v32 = vmul.f32 %v3455_v54, %v4544_v1  ;;  %v1806_v60 = vmax.f32 %v1790_v34, 0.0 }
 0x172   : > { %v1791_v28 = vadd.f32 %v4503_v58, %v1771_v2  ;;  %v1515_v39 = vmul.f32 %v3455_v54, %v4545_v46  ;;  %v1552_v5 = vmul.f32 %v3009_v19, %v4544_v1  ;;  %v1337_v20 = vsel %vm1033_vm14, %v1335_v33, %v1336_v35  ;;  %v4553_v2 = vld [vmem:[#allocation7_spill] sm:$0xff]  ;;  %v4557_v33 = vld [vmem:[#allocation8_spill] sm:$0xff] }
 0x173   : > { %v4547_v58 = vrot.slane %v4546_v14, 1  ;;  %v1458_v63 = vsel %vm1155_vm15, %v1456_v12, %v1457_v40  ;;  %v4549_v29 = vrot.slane %v4548_v61, 2  ;;  %v1822_v30 = vmin.f32 %v1806_v60, 6.0  ;;  %v4558_v12 = vld [vmem:[#allocation16_spill] sm:$0xff]  ;;  %v4560_v14 = vld [vmem:[#allocation11_spill] sm:$0xff] }
 0x174   : > { %v1807_v0 = vmax.f32 %v1791_v28, 0.0  ;;  %v1376_v49 = vadd.f32 %v1337_v20, %v1255_v36  ;;  %v1553_v47 = vmul.f32 %v3009_v19, %v4545_v46  ;;  %v1610_v56 = vrot.slane %v1552_v5, 1 }
 0x175   : > { %v1339_v3 = vsel %vm1033_vm14, %v1336_v35, %v4547_v58  ;;  %v1460_v25 = vsel %vm1155_vm15, %v1457_v40, %v4549_v29  ;;  %v1673_v52 = vmul.f32 %v4178_v15, %v4544_v1  ;;  %v1674_v22 = vmul.f32 %v4178_v15, %v4545_v46  ;;  %v4559_v40 = vld [vmem:[#allocation17_spill] sm:$0xff] }
 0x176   : > { %v1823_v16 = vmin.f32 %v1807_v0, 6.0  ;;  %v1377_v27 = vadd.f32 %v1339_v3, %v1256_v21  ;;  %v1497_v48 = vadd.f32 %v1458_v63, %v1376_v49  ;;  %v1675_v23 = vmul.f32 %v4178_v15, %v4550_v41 }
 0x177   : > { %v1611_v51 = vrot.slane %v1553_v47, 1  ;;  %v1731_v19 = vrot.slane %v1673_v52, 2  ;;  %v1732_v37 = vrot.slane %v1674_v22, 2  ;;  %v964_v45 = vmul.f32 %v2993_v13, %v4539_v59 }
 0x178   : > { %v1834_v11 = vpack.c.bf16 %v1823_v16, %v1822_v30  ;;  %v1498_v24 = vadd.f32 %v1460_v25, %v1377_v27  ;;  %v1530_v62 = vadd.f32 %v1514_v32, %v1497_v48  ;;  %v1734_v42 = vrot.slane %v1675_v23, 2  ;;  %v4564_v23 = vld [vmem:[#allocation21_spill] sm:$0xff] }
 0x179   : > { %v4552_v50 = vrot.slane %v4551_v31, 1  ;;  %v4554_v53 = vrot.slane %v4553_v2, 1  ;;  %v1612_v21 = vsel %vm1033_vm14, %v1610_v56, %v1611_v51  ;;  %v4556_v9 = vrot.slane %v4555_v55, 1  ;;  %v4562_v56 = vld [vmem:[#allocation37_spill] sm:$0xff]  ;;  %v4568_v55 = vld [vmem:[#allocation22_spill] sm:$0xff] }
 0x17a   : > { %v1531_v4 = vadd.f32 %v1515_v39, %v1498_v24  ;;  %v1733_v34 = vsel %vm1155_vm15, %v1731_v19, %v1732_v37  ;;  %v1651_v36 = vadd.f32 %v1612_v21, %v1530_v62  ;;  %v1735_v59 = vsel %vm1155_vm15, %v1732_v37, %v1734_v42  ;;  %v4229_v37 = vpop.f32.mrf.mxu2  ;;  %v4566_v62 = vld [vmem:[#allocation26_spill] sm:$0xff] }
 0x17b   : > { %v1066_v26 = vsel %vm1033_vm14, %v4554_v53, %v4552_v50  ;;  %v1614_v10 = vsel %vm1033_vm14, %v1611_v51, %v4556_v9  ;;  %v1186_v35 = vrot.slane %v4557_v33, 2  ;;  %v1225_v32 = vadd.f32 %v4559_v40, %v4558_v12  ;;  %v4567_v50 = vld [vmem:[#allocation30_spill] sm:$0xff] }
 0x17c   : > { %v1102_v28 = vadd.f32 %v1066_v26, %v964_v45  ;;  %v1652_v13 = vadd.f32 %v1614_v10, %v1531_v4  ;;  %v1241_v60 = vmul.f32 %v3048_v57, %v4544_v1  ;;  %v1242_v0 = vmul.f32 %v3048_v57, %v4545_v46  ;;  %1934 = vmatmul.bf16.gmra.mxu1 %v1834_v11  ;;  %v2665_v57 = vld [vmem:[%s4353_s5] ss:$0 sm:$0xff] }
 0x17d   : > { %v1280_v39 = vmul.f32 %v3003_v17, %v4544_v1  ;;  %v1772_v5 = vadd.f32 %v1733_v34, %v1651_v36  ;;  %v4561_v58 = vrot.slane %v4560_v14, 2  ;;  %v1281_v63 = vmul.f32 %v3003_v17, %v4545_v46  ;;  %v4563_v17 = vld [vmem:[#allocation35_spill] sm:$0xff] }
 0x17e   : > { %v1773_v20 = vadd.f32 %v1735_v59, %v1652_v13  ;;  %v1258_v29 = vadd.f32 %v1242_v0, %v1225_v32  ;;  %v1401_v30 = vmul.f32 %v3006_v18, %v4544_v1  ;;  %v1402_v47 = vmul.f32 %v3006_v18, %v4545_v46 }
 0x17f   : > { %v1188_v3 = vsel %vm1155_vm15, %v1186_v35, %v4561_v58  ;;  %v1340_v25 = vrot.slane %v1280_v39, 1  ;;  %v1792_v16 = vadd.f32 %v2665_v57, %v1772_v5  ;;  %v1341_v27 = vrot.slane %v1281_v63, 1  ;;  %v4572_v35 = vld [vmem:[#allocation29_spill] sm:$0xff] }
 0x180   : > { %v1224_v61 = vadd.f32 %v1188_v3, %v1102_v28  ;;  %v1793_v49 = vadd.f32 %v2665_v57, %v1773_v20  ;;  %v1618_v52 = vrot.slane %v4562_v56, 1  ;;  %v1678_v22 = vmul.f32 %v4178_v15, %v4563_v17 }
 0x181   : > { %v1461_v48 = vrot.slane %v1401_v30, 2  ;;  %v1808_v24 = vmax.f32 %v1792_v16, 0.0  ;;  %v1342_v1 = vsel %vm1033_vm14, %v1340_v25, %v1341_v27  ;;  %v4565_v51 = vrot.slane %v4564_v23, 1 }
 0x182   : > { %v1257_v11 = vadd.f32 %v1241_v60, %v1224_v61  ;;  %v1809_v41 = vmax.f32 %v1793_v49, 0.0  ;;  %v1462_v46 = vrot.slane %v1402_v47, 2  ;;  %v1516_v4 = vmul.f32 %v3455_v54, %v4566_v62  ;;  %v2228_v30 = vpop.f32.mrf.mxu2 }
 0x183   : > { %v1344_v19 = vsel %vm1033_vm14, %v1341_v27, %v4565_v51  ;;  %v1824_v42 = vmin.f32 %v1808_v24, 6.0  ;;  %v1517_v2 = vmul.f32 %v3455_v54, %v4567_v50  ;;  %v1676_v53 = vmul.f32 %v4178_v15, %v4566_v62  ;;  %v4570_v54 = vld [vmem:[#allocation32_spill] sm:$0xff]  ;;  %v1915_v63 = vpop.f32.mrf.mxu1 }
 0x184   : > { %v1378_v45 = vadd.f32 %v1342_v1, %v1257_v11  ;;  %v1379_v18 = vadd.f32 %v1344_v19, %v1258_v29  ;;  %v1825_v31 = vmin.f32 %v1809_v41, 6.0  ;;  %v1739_v26 = vrot.slane %v1678_v22, 2 }
 0x185   : > { %v1463_v21 = vsel %vm1155_vm15, %v1461_v48, %v1462_v46  ;;  %v4569_v9 = vrot.slane %v4568_v55, 2  ;;  %v1677_v34 = vmul.f32 %v4178_v15, %v4567_v50  ;;  %v1736_v59 = vrot.slane %v1676_v53, 2  ;;  %v4255_v15 = vld [vmem:[%s4355_s7] ss:$0 sm:$0xff] }
 0x186   : > { %v1835_v28 = vpack.c.bf16 %v1825_v31, %v1824_v42  ;;  %v1499_v36 = vadd.f32 %v1463_v21, %v1378_v45  ;;  %v4571_v33 = vrot.slane %v4570_v54, 1  ;;  %v4573_v12 = vrot.slane %v4572_v35, 1 }
 0x187   : > { %v1465_v10 = vsel %vm1155_vm15, %v1462_v46, %v4569_v9  ;;  %v1737_v0 = vrot.slane %v1677_v34, 2  ;;  %v1916_v61 = vadd.f32 %v4255_v15, %v1915_v63 }
 0x188   : > { %v1500_v13 = vadd.f32 %v1465_v10, %v1379_v18  ;;  %v1617_v40 = vsel %vm1033_vm14, %v4573_v12, %v4571_v33  ;;  %v4574_v32 = vmov %v4571_v33  ;;  %v1532_v39 = vadd.f32 %v1516_v4, %v1499_v36 }
 0x189   : > { %v1619_v60 = vsel %vm1033_vm14, %v4574_v32, %v1618_v52  ;;  %v1738_v20 = vsel %vm1155_vm15, %v1736_v59, %v1737_v0  ;;  %v1740_v14 = vsel %vm1155_vm15, %v1737_v0, %v1739_v26  ;;  %v2251_v16 = vadd.f32 %v3971_v6, %v1916_v61 }
 0x18a   : > { %v1533_v5 = vadd.f32 %v1517_v2, %v1500_v13  ;;  %v1653_v58 = vadd.f32 %v1617_v40, %v1532_v39  ;;  %v2231_v24 = vpop.f32.mrf.mxu2 }
 0x18b   : > { %2267 = vst [vmem:[%s4263_s18] sm:$0xff] %v2251_v16  ;;  %v1917_v22 = vpop.f32.mrf.mxu1 }
 0x18c   : > { %v1654_v3 = vadd.f32 %v1619_v60, %v1533_v5  ;;  %v1774_v29 = vadd.f32 %v1738_v20, %v1653_v58  ;;  %1939 = vmatmul.bf16.gmra.mxu1 %v1835_v28  ;;  %v1918_v11 = vadd.f32 %v4255_v15, %v1917_v22 }
 0x18e   : > { %v1775_v25 = vadd.f32 %v1740_v14, %v1654_v3  ;;  %v1794_v49 = vadd.f32 %v2665_v57, %v1774_v29  ;;  %v2252_v6 = vadd.f32 %v4020_v44, %v1918_v11 }
 0x190   : > { %v1795_v27 = vadd.f32 %v2665_v57, %v1775_v25  ;;  %v1810_v47 = vmax.f32 %v1794_v49, 0.0  ;;  %2268 = vst [vmem:[%s4263_s18 + $0x8] sm:$0xff] %v2252_v6 }
 0x192   : > { %v1811_v56 = vmax.f32 %v1795_v27, 0.0  ;;  %v1826_v52 = vmin.f32 %v1810_v47, 6.0  ;;  %v2233_v57 = vpop.f32.mrf.mxu2 }
 0x194   : > { %v1827_v17 = vmin.f32 %v1811_v56, 6.0 }
 0x196   : > { %v1836_v48 = vpack.c.bf16 %v1827_v17, %v1826_v52 }
 0x19c   : > { %1944 = vmatmul.bf16.gmra.mxu1 %v1836_v48 }
 0x19e   : > { %v2236_v41 = vpop.f32.mrf.mxu2 }
 0x1a6   : > { %v2238_v1 = vpop.f32.mrf.mxu2 }
 0x1b3   : > { %v1920_v23 = vpop.f32.mrf.mxu1 }
 0x1b4   : > { %v1921_v51 = vadd.f32 %v4255_v15, %v1920_v23 }
 0x1b6   : > { %v2253_v19 = vadd.f32 %v4061_v43, %v1921_v51 }
 0x1b8   : > { %2269 = vst [vmem:[%s4263_s18 + $0x10] sm:$0xff] %v2253_v19 }
 0x1b9   : > { %v2241_v45 = vpop.f32.mrf.mxu2 }
 0x1bb   : > { %v1922_v18 = vpop.f32.mrf.mxu1 }
 0x1bc   : > { %v1923_v46 = vadd.f32 %v4255_v15, %v1922_v18 }
 0x1be   : > { %v2254_v44 = vadd.f32 %v4100_v38, %v1923_v46 }
 0x1c0   : > { %2270 = vst [vmem:[%s4263_s18 + $0x18] sm:$0xff] %v2254_v44  ;;  %v1950_v4 = vpop.f32.mrf.mxu3 }
 0x1c1   : > { %v2243_v62 = vpop.f32.mrf.mxu2  ;;  %v1951_v42 = vadd.f32 %v4255_v15, %v1950_v4 }
 0x1c8   : > { %v1952_v2 = vpop.f32.mrf.mxu3 }
 0x1c9   : > { %v2246_v31 = vpop.f32.mrf.mxu2  ;;  %v1953_v43 = vadd.f32 %v4255_v15, %v1952_v2 }
 0x1ca   : > { %v2265_v50 = vadd.f32 %v2246_v31, %v1951_v42 }
 0x1cc   : > { %2281 = vst [vmem:[%s4263_s18 + $0x70] sm:$0xff] %v2265_v50 }
 0x1d1   : > { %v2248_v53 = vpop.f32.mrf.mxu2 }
 0x1d2   : > { %v2266_v26 = vadd.f32 %v2248_v53, %v1953_v43 }
 0x1d4   : > { %2282 = vst [vmem:[%s4263_s18 + $0x78] sm:$0xff] %v2266_v26 }
 0x1d9   : > { %v1925_v21 = vpop.f32.mrf.mxu1 }
 0x1da   : > { %v1926_v38 = vadd.f32 %v4255_v15, %v1925_v21 }
 0x1dc   : > { %v2255_v55 = vadd.f32 %v4138_v8, %v1926_v38 }
 0x1de   : > { %2271 = vst [vmem:[%s4263_s18 + $0x20] sm:$0xff] %v2255_v55 }
 0x1e1   : > { %v1927_v9 = vpop.f32.mrf.mxu1 }
 0x1e2   : > { %v1928_v10 = vadd.f32 %v4255_v15, %v1927_v9 }
 0x1e4   : > { %v2256_v34 = vadd.f32 %v4186_v7, %v1928_v10 }
 0x1e6   : > { %2272 = vst [vmem:[%s4263_s18 + $0x28] sm:$0xff] %v2256_v34 }
 0x1e9   : > { %v1930_v28 = vpop.f32.mrf.mxu1 }
 0x1ea   : > { %v1931_v36 = vadd.f32 %v4255_v15, %v1930_v28 }
 0x1ec   : > { %v2257_v13 = vadd.f32 %v4229_v37, %v1931_v36 }
 0x1ee   : > { %2273 = vst [vmem:[%s4263_s18 + $0x30] sm:$0xff] %v2257_v13 }
 0x1f1   : > { %v1932_v59 = vpop.f32.mrf.mxu1 }
 0x1f2   : > { %v1933_v54 = vadd.f32 %v4255_v15, %v1932_v59 }
 0x1f4   : > { %v2258_v8 = vadd.f32 %v2228_v30, %v1933_v54 }
 0x1f6   : > { %2274 = vst [vmem:[%s4263_s18 + $0x38] sm:$0xff] %v2258_v8 }
 0x1f9   : > { %v1935_v33 = vpop.f32.mrf.mxu1 }
 0x1fa   : > { %v1936_v35 = vadd.f32 %v4255_v15, %v1935_v33 }
 0x1fc   : > { %v2259_v7 = vadd.f32 %v2231_v24, %v1936_v35 }
 0x1fe   : > { %2275 = vst [vmem:[%s4263_s18 + $0x40] sm:$0xff] %v2259_v7 }
 0x201   : > { %v1937_v12 = vpop.f32.mrf.mxu1 }
 0x202   : > { %v1938_v40 = vadd.f32 %v4255_v15, %v1937_v12 }
 0x204   : > { %v2260_v32 = vadd.f32 %v2233_v57, %v1938_v40 }
 0x206   : > { %2276 = vst [vmem:[%s4263_s18 + $0x48] sm:$0xff] %v2260_v32 }
 0x209   : > { %v1940_v37 = vpop.f32.mrf.mxu1 }
 0x20a   : > { %v1941_v60 = vadd.f32 %v4255_v15, %v1940_v37 }
 0x20c   : > { %v2261_v0 = vadd.f32 %v2236_v41, %v1941_v60 }
 0x20e   : > { %2277 = vst [vmem:[%s4263_s18 + $0x50] sm:$0xff] %v2261_v0 }
 0x211   : > { %v1942_v39 = vpop.f32.mrf.mxu1 }
 0x212   : > { %v1943_v5 = vadd.f32 %v4255_v15, %v1942_v39 }
 0x214   : > { %v2262_v20 = vadd.f32 %v2238_v1, %v1943_v5 }
 0x216   : > { %2278 = vst [vmem:[%s4263_s18 + $0x58] sm:$0xff] %v2262_v20 }
 0x219   : > { %v1945_v14 = vpop.f32.mrf.mxu1 }
 0x21a   : > { %v1946_v58 = vadd.f32 %v4255_v15, %v1945_v14 }
 0x21c   : > { %v2263_v3 = vadd.f32 %v2241_v45, %v1946_v58 }
 0x21e   : > { %2279 = vst [vmem:[%s4263_s18 + $0x60] sm:$0xff] %v2263_v3 }
 0x221   : > { %v1947_v63 = vpop.f32.mrf.mxu1 }
 0x222   : > { %v1948_v61 = vadd.f32 %v4255_v15, %v1947_v63 }
 0x224   : > { %v2264_v29 = vadd.f32 %v2243_v62, %v1948_v61 }
 0x226   : > { %2280 = vst [vmem:[%s4263_s18 + $0x68] sm:$0xff] %v2264_v29 }
 0x227   : > { %2693 = shalt.err (!%p2690_p9)
}
 0x228   : > { %s2762_s18 = smov 128   ;;  %s2763_s12 = smov 8  }
 0x229   : > { %2586 = dma.vmem_to_hbm [thread:$0]  (%p2865_p3), %s2299_s2, 2048, %s2301_s26, %s2284_s13, %s2762_s18, %s2762_s18, %s2763_s12  }
 0x22a PF: > { %p2592_p10 = scmp.ge.s32.totalorder %s2760_s16, 2  ;;  %s2315_s29 = sand.u32 1, %s2732_s30  }
 0x22b   : > { %s2316_s17 = scalar_lea.sflag [#allocation3], %s2315_s29 }
 0x22c   : > { %p2589_p11 = pnand %p2592_p10, %p2874_p8 }
 0x22e   : > { %p2590_p12 = pneg %p2589_p11 }
 0x230   : > { %2727 = dma.done.wait (%p2590_p12), %s2316_s17, 2048  }
 0x231   : > { %2729 = vsyncadd (%p2590_p12), %s2316_s17, 4294965248  ;;  %s22_s16 = sadd.s32 1, %s2760_s16   ;;  %s4576_s22 = sld [smem:[#allocation5_spill]] }
 0x232   : > { %p19_p13 = scmp.ge.s32.totalorder %s22_s16, 6   ;;  %s4577_s30 = smov %s2736_s10 }
 0x233   : > { %s4578_s10 = smov %s2740_s11  ;;  %s4579_s11 = smov %s2883_s27 }
 0x234   : > { %s4580_s12 = smov %s2752_s14  ;;  %s4581_s13 = smov %s2756_s15 }
 0x235   : > { %s4582_s14 = smov %s4585_s19  ;;  %21 = sbr.rel (!%p19_p13) target bundleno = 7 (0x7), region = 94 }
 0x237   : > { %s4583_s15 = smov %s4576_s22 }
 0x23a   :  { %2322 = vsyncpa [#allocation3], 1 }
 0x23b   :  { %2324 = vsyncpa [#allocation3 + $0x1], 1 }

</bundles_post_ra>
